<compile_context>
chip_gen: v5e
topology: v5e:2x2
jax: 0.10.0
libtpu: 0.0.40
codegen_flags: <defaults>
</compile_context>

<pallas_src>
import functools

import jax
import jax.numpy as jnp
from jax.experimental import pallas as pl
from jax.experimental.pallas import tpu as pltpu

HIDDEN = 128
INPUT_DIM = 6
CTX_DIM = INPUT_DIM + 1      # 7
PAD_DIM = 8                  # 7 -> 8 and 6 -> 8 zero padding on the feature axis
VMEM_LIMIT_BYTES = 32 * 1024 * 1024   # fits scoped VMEM on v5e/v6e/v7x


def _round_up(x, m):
    return ((x + m - 1) // m) * m


def _pick_tile(n, requested):
    """Tile along the lane (last) axis: either one block covering everything,
    or a multiple of 128 so every block is lane-aligned."""
    requested = max(int(requested), 8)
    if n <= requested:
        tile = _round_up(n, 8)
    else:
        tile = _round_up(requested, 128)
    return tile, _round_up(n, tile)


def _softplus(x):
    # numerically stable softplus = log(1 + exp(x))
    return jnp.maximum(x, 0.0) + jnp.log1p(jnp.exp(-jnp.abs(x)))


# ---------------------------------------------------------------------------
# Encoder pass: grid (B, S_pad // TILE_S), feature-first.
# h is (128, TILE_S); the per-tile lane-sum accumulates into a (128, 1) VMEM
# scratch; at the last S step it is scaled by 1/n (SMEM) and pushed through the
# hoisted latent @ dwl projection (+ folded decoder bias db0).
# ---------------------------------------------------------------------------
def _encoder_kernel(ctx_ref, inv_n_ref,
                    ew0_ref, eb0_ref, ew1_ref, eb1_ref,
                    ew2_ref, eb2_ref, ew3_ref, eb3_ref,
                    dwl_ref, db0_ref,
                    latproj_ref,
                    acc_ref,
                    *, s_valid, s_pad, tile_s):
    b = pl.program_id(0)
    s = pl.program_id(1)

    @pl.when(s == 0)
    def _():
        acc_ref[...] = jnp.zeros_like(acc_ref)

    x = ctx_ref[...].reshape(PAD_DIM, tile_s)                         # bf16 (8, Ts)
    h = jnp.dot(ew0_ref[...], x, preferred_element_type=jnp.float32) + eb0_ref[...]
    h = jnp.maximum(h, 0.0)
    h = jnp.dot(ew1_ref[...], h.astype(jnp.bfloat16),
                preferred_element_type=jnp.float32) + eb1_ref[...]
    h = jnp.maximum(h, 0.0)
    h = jnp.dot(ew2_ref[...], h.astype(jnp.bfloat16),
                preferred_element_type=jnp.float32) + eb2_ref[...]
    h = jnp.maximum(h, 0.0)
    h = jnp.dot(ew3_ref[...], h.astype(jnp.bfloat16),
                preferred_element_type=jnp.float32) + eb3_ref[...]    # (128, Ts) f32

    # Zero out S-padding columns (bias makes MLP(0) != 0). Static no-op if
    # the problem size already matches the padded size.
    if s_valid != s_pad:
        col = s * tile_s + jax.lax.broadcasted_iota(jnp.int32, h.shape, 1)
        h = jnp.where(col < s_valid, h, 0.0)

    acc_ref[...] += jnp.sum(h, axis=1, keepdims=True)                 # (128, 1) f32

    @pl.when(s == pl.num_programs(1) - 1)
    def _():
        latent = acc_ref[...] * inv_n_ref[b, 0]                       # (128, 1) f32
        # hoisted first-decoder-layer latent projection + folded db0
        # (N broadcast to 8 columns keeps the matmul on fully standard shapes)
        lat8 = jnp.broadcast_to(latent, (HIDDEN, 8)).astype(jnp.bfloat16)
        proj8 = jnp.dot(dwl_ref[...], lat8,
                        preferred_element_type=jnp.float32)           # (128, 8) f32
        latproj_ref[...] = (proj8[:, 0:1] + db0_ref[...]).reshape(1, HIDDEN, 1)


# ---------------------------------------------------------------------------
# Decoder pass: grid (T_pad // TILE_T, B), feature-first.
# g is (128, TILE_T); lat (latent@dwl + db0) is a (128, 1) column broadcast;
# the final layer produces (8, TILE_T) (padded M) and rows 0/1 are written as a
# lane-dense (1, 2, TILE_T) block (mu row / transformed-sigma row).
# ---------------------------------------------------------------------------
def _decoder_kernel(tx_ref, lat_ref,
                    dwx_ref, dw1_ref, db1_ref, dw2_ref, db2_ref,
                    dw3_ref, db3_ref,
                    out_ref,
                    *, tile_t):
    x = tx_ref[...].reshape(PAD_DIM, tile_t)                          # bf16 (8, Tt)
    lat = lat_ref[...].reshape(HIDDEN, 1)                             # f32 (128, 1)

    g = jnp.dot(dwx_ref[...], x, preferred_element_type=jnp.float32) + lat
    g = jnp.maximum(g, 0.0)
    g = jnp.dot(dw1_ref[...], g.astype(jnp.bfloat16),
                preferred_element_type=jnp.float32) + db1_ref[...]
    g = jnp.maximum(g, 0.0)
    g = jnp.dot(dw2_ref[...], g.astype(jnp.bfloat16),
                preferred_element_type=jnp.float32) + db2_ref[...]
    g = jnp.maximum(g, 0.0)
    raw8 = jnp.dot(dw3_ref[...], g.astype(jnp.bfloat16),
                   preferred_element_type=jnp.float32)                # (8, Tt) f32
    raw = raw8[0:2, :] + db3_ref[...]                                 # (2, Tt) f32

    # row 0 -> mu (identity); row 1 -> sigma = 0.1 + 0.9*softplus(log_sigma)
    row = jax.lax.broadcasted_iota(jnp.int32, raw.shape, 0)
    sig = 0.1 + 0.9 * _softplus(raw)
    out_ref[...] = jnp.where(row == 0, raw, sig).reshape(1, 2, tile_t)


# ---------------------------------------------------------------------------
# Wrapper
# ---------------------------------------------------------------------------
def cnp_forward(context, context_mask, target_x, params, *, tile_s=2048, tile_t=2048):
    (ew0, eb0, ew1, eb1, ew2, eb2, ew3, eb3,
     dwl, dwx, db0, dw1, db1, dw2, db2, dw3, db3) = params
    B, S, _ = context.shape
    T = target_x.shape[1]

    TILE_S, S_pad = _pick_tile(S, tile_s)
    TILE_T, T_pad = _pick_tile(T, tile_t)

    # Feature-first inputs (B, 8, S/T) bf16: one fused transpose+pad+cast prep
    # pass per input (replaces the previous pad/cast pass — not an extra one).
    ctx_t = jnp.zeros((B, PAD_DIM, S_pad), jnp.bfloat16)
    ctx_t = ctx_t.at[:, :CTX_DIM, :S].set(
        jnp.swapaxes(context, 1, 2).astype(jnp.bfloat16))
    tx_t = jnp.zeros((B, PAD_DIM, T_pad), jnp.bfloat16)
    tx_t = tx_t.at[:, :INPUT_DIM, :T].set(
        jnp.swapaxes(target_x, 1, 2).astype(jnp.bfloat16))

    # 1/n computed once here (no (B,S) mask DMA, no in-kernel reduce).
    # NOTE: zero valid context points -> inf latent (faithful to the PyTorch code).
    n = jnp.sum(context_mask.astype(jnp.float32), axis=1, keepdims=True)   # (B, 1)
    inv_n = (1.0 / n).astype(jnp.float32)

    # Weights transposed once (bf16 matmul operands); biases as f32 columns.
    wt = lambda w: jnp.asarray(w).T.astype(jnp.bfloat16)
    bc = lambda v: jnp.asarray(v).reshape(-1, 1).astype(jnp.float32)
    ew0_t = jnp.zeros((HIDDEN, PAD_DIM), jnp.bfloat16).at[:, :CTX_DIM].set(wt(ew0))
    dwx_t = jnp.zeros((HIDDEN, PAD_DIM), jnp.bfloat16).at[:, :INPUT_DIM].set(wt(dwx))
    dw3_t = jnp.zeros((PAD_DIM, HIDDEN), jnp.bfloat16).at[:2, :].set(wt(dw3))

    # Constant-index BlockSpecs keep weights resident in VMEM across grid steps.
    wspec = lambda shape: pl.BlockSpec(shape, lambda i, j: (0, 0))

    # ------------- pass 1: encoder + aggregation + latent@dwl + db0 -------------
    enc_args = (ctx_t, inv_n,
                ew0_t, bc(eb0), wt(ew1), bc(eb1), wt(ew2), bc(eb2),
                wt(ew3), bc(eb3), wt(dwl), bc(db0))
    enc_in_specs = [
        pl.BlockSpec((1, PAD_DIM, TILE_S), lambda b, s: (b, 0, s)),
        pl.BlockSpec(memory_space=pltpu.MemorySpace.SMEM),
        wspec((HIDDEN, PAD_DIM)), wspec((HIDDEN, 1)),
        wspec((HIDDEN, HIDDEN)), wspec((HIDDEN, 1)),
        wspec((HIDDEN, HIDDEN)), wspec((HIDDEN, 1)),
        wspec((HIDDEN, HIDDEN)), wspec((HIDDEN, 1)),
        wspec((HIDDEN, HIDDEN)), wspec((HIDDEN, 1)),
    ]
    lat_proj = pl.pallas_call(
        functools.partial(_encoder_kernel, s_valid=S, s_pad=S_pad, tile_s=TILE_S),
        out_shape=jax.ShapeDtypeStruct((B, HIDDEN, 1), jnp.float32),
        grid_spec=pltpu.PrefetchScalarGridSpec(
            num_scalar_prefetch=0,
            grid=(B, S_pad // TILE_S),
            in_specs=enc_in_specs,
            out_specs=pl.BlockSpec((1, HIDDEN, 1), lambda b, s: (b, 0, 0)),
            scratch_shapes=[pltpu.VMEM((HIDDEN, 1), jnp.float32)]),
        compiler_params=pltpu.CompilerParams(
            dimension_semantics=("parallel", "arbitrary"),
            vmem_limit_bytes=VMEM_LIMIT_BYTES),
    )(*enc_args)

    # ------------- pass 2: decoder over target tiles (T axis leading) -------------
    dec_args = (tx_t, lat_proj,
                dwx_t, wt(dw1), bc(db1), wt(dw2), bc(db2), dw3_t, bc(db3))
    dec_in_specs = [
        pl.BlockSpec((1, PAD_DIM, TILE_T), lambda t, b: (b, 0, t)),
        pl.BlockSpec((1, HIDDEN, 1), lambda t, b: (b, 0, 0)),
        wspec((HIDDEN, PAD_DIM)),
        wspec((HIDDEN, HIDDEN)), wspec((HIDDEN, 1)),
        wspec((HIDDEN, HIDDEN)), wspec((HIDDEN, 1)),
        wspec((PAD_DIM, HIDDEN)), wspec((2, 1)),
    ]
    out = pl.pallas_call(
        functools.partial(_decoder_kernel, tile_t=TILE_T),
        out_shape=jax.ShapeDtypeStruct((B, 2, T_pad), jnp.float32),
        grid_spec=pltpu.PrefetchScalarGridSpec(
            num_scalar_prefetch=0,
            grid=(T_pad // TILE_T, B),
            in_specs=dec_in_specs,
            out_specs=pl.BlockSpec((1, 2, TILE_T), lambda t, b: (b, 0, t))),
        compiler_params=pltpu.CompilerParams(
            dimension_semantics=("parallel", "parallel"),
            vmem_limit_bytes=VMEM_LIMIT_BYTES),
    )(*dec_args)

    mu = out[:, 0, :T]
    sigma = out[:, 1, :T]
    return mu, sigma


# ---------------------------------------------------------------------------
# Params + pure-JAX reference (f32, faithful to the PyTorch forward)
# ---------------------------------------------------------------------------
def init_params(key):
    """Deterministic Xavier-uniform weights / small uniform biases."""
    def linear(key, fan_in, fan_out):
        kw, kb = jax.random.split(key)
        limit = (6.0 / (fan_in + fan_out)) ** 0.5
        w = jax.random.uniform(kw, (fan_in, fan_out), jnp.float32, -limit, limit)
        blim = 1.0 / (fan_in ** 0.5)
        b = jax.random.uniform(kb, (fan_out,), jnp.float32, -blim, blim)
        return w, b

    keys = jax.random.split(key, 8)
    ew0, eb0 = linear(keys[0], CTX_DIM, HIDDEN)
    ew1, eb1 = linear(keys[1], HIDDEN, HIDDEN)
    ew2, eb2 = linear(keys[2], HIDDEN, HIDDEN)
    ew3, eb3 = linear(keys[3], HIDDEN, HIDDEN)
    dw0, db0 = linear(keys[4], HIDDEN + INPUT_DIM, HIDDEN)
    dwl, dwx = dw0[:HIDDEN, :], dw0[HIDDEN:, :]
    dw1, db1 = linear(keys[5], HIDDEN, HIDDEN)
    dw2, db2 = linear(keys[6], HIDDEN, HIDDEN)
    dw3, db3 = linear(keys[7], HIDDEN, 2)
    return (ew0, eb0, ew1, eb1, ew2, eb2, ew3, eb3,
            dwl, dwx, db0, dw1, db1, dw2, db2, dw3, db3)


def cnp_reference(context, context_mask, target_x, params):
    (ew0, eb0, ew1, eb1, ew2, eb2, ew3, eb3,
     dwl, dwx, db0, dw1, db1, dw2, db2, dw3, db3) = params
    h = jax.nn.relu(context @ ew0 + eb0)
    h = jax.nn.relu(h @ ew1 + eb1)
    h = jax.nn.relu(h @ ew2 + eb2)
    h = h @ ew3 + eb3
    n = jnp.sum(context_mask.astype(jnp.float32), axis=1, keepdims=True)
    latent = jnp.sum(h, axis=1) / n
    T = target_x.shape[1]
    lat = jnp.broadcast_to(latent[:, None, :], (latent.shape[0], T, HIDDEN))
    cat = jnp.concatenate([lat, target_x], axis=2)
    w0 = jnp.concatenate([dwl, dwx], axis=0)
    g = jax.nn.relu(cat @ w0 + db0)
    g = jax.nn.relu(g @ dw1 + db1)
    g = jax.nn.relu(g @ dw2 + db2)
    out = g @ dw3 + db3
    mu = out[:, :, 0]
    sigma = 0.1 + 0.9 * jax.nn.softplus(out[:, :, 1])
    return mu, sigma


if __name__ == "__main__":
    key = jax.random.PRNGKey(0)
    kp, kc, km, kt = jax.random.split(key, 4)
    params = init_params(kp)

    def run_case(B, S, T, **tiles):
        context = jax.random.normal(kc, (B, S, CTX_DIM), jnp.float32)
        context_mask = (jax.random.uniform(km, (B, S)) > 0.3).astype(jnp.float32)
        context_mask = context_mask.at[:, 0].set(1.0)   # avoid zero-count division
        target_x = jax.random.normal(kt, (B, T, INPUT_DIM), jnp.float32)

        mu, sigma = cnp_forward(context, context_mask, target_x, params, **tiles)
        jax.block_until_ready((mu, sigma))

        mu_ref, sigma_ref = cnp_reference(context, context_mask, target_x, params)
        assert mu.shape == (B, T) and sigma.shape == (B, T)
        # bf16 matmul operands (f32 accumulation) -> loosened tolerance vs f32 ref
        assert jnp.allclose(mu, mu_ref, atol=3e-2, rtol=3e-2), \
            float(jnp.max(jnp.abs(mu - mu_ref)))
        assert jnp.allclose(sigma, sigma_ref, atol=3e-2, rtol=3e-2), \
            float(jnp.max(jnp.abs(sigma - sigma_ref)))
        assert bool(jnp.all(sigma >= 0.1))

    # single-tile case with non-multiple-of-8 sizes (exercises tail masking)
    run_case(B=2, S=13, T=10)
    # multi-tile case: exercises the S-reduction grid (pl.when init/finalize,
    # boundary masking at S_pad > S) and the multi-tile lane-aligned target grid
    run_case(B=2, S=300, T=200, tile_s=128, tile_t=128)

    print("KERNEL_OK")
</pallas_src>

<mosaic_0001>
module attributes {stable_mosaic.version = 11 : i64} {
  func.func @_encoder_kernel(%arg0: i32, %arg1: i32, %arg2: memref<1x8x16xbf16, #tpu.memory_space<vmem>>, %arg3: memref<2x1xf32, #tpu.memory_space<smem>>, %arg4: memref<128x8xbf16, #tpu.memory_space<vmem>>, %arg5: memref<128x1xf32, #tpu.memory_space<vmem>>, %arg6: memref<128x128xbf16, #tpu.memory_space<vmem>>, %arg7: memref<128x1xf32, #tpu.memory_space<vmem>>, %arg8: memref<128x128xbf16, #tpu.memory_space<vmem>>, %arg9: memref<128x1xf32, #tpu.memory_space<vmem>>, %arg10: memref<128x128xbf16, #tpu.memory_space<vmem>>, %arg11: memref<128x1xf32, #tpu.memory_space<vmem>>, %arg12: memref<128x128xbf16, #tpu.memory_space<vmem>>, %arg13: memref<128x1xf32, #tpu.memory_space<vmem>>, %arg14: memref<1x128x1xf32, #tpu.memory_space<vmem>>, %arg15: memref<128x1xf32, #tpu.memory_space<vmem>>) attributes {dimension_semantics = [#tpu.dimension_semantics<parallel>, #tpu.dimension_semantics<arbitrary>], iteration_bounds = array<i64: 2, 1>, scalar_prefetch = 0 : i64, scratch_operands = 1 : i64, tpu.core_type = #tpu.core_type<tc>, window_params = [{transform_indices = @transform_0, window_bounds = array<i64: 1, 8, 16>}, {transform_indices = @transform_1, window_bounds = array<i64: 2, 1>}, {pipeline_mode = #tpu.pipeline_mode<synchronous>, transform_indices = @transform_2, window_bounds = array<i64: 128, 8>}, {pipeline_mode = #tpu.pipeline_mode<synchronous>, transform_indices = @transform_3, window_bounds = array<i64: 128, 1>}, {pipeline_mode = #tpu.pipeline_mode<synchronous>, transform_indices = @transform_4, window_bounds = array<i64: 128, 128>}, {pipeline_mode = #tpu.pipeline_mode<synchronous>, transform_indices = @transform_5, window_bounds = array<i64: 128, 1>}, {pipeline_mode = #tpu.pipeline_mode<synchronous>, transform_indices = @transform_6, window_bounds = array<i64: 128, 128>}, {pipeline_mode = #tpu.pipeline_mode<synchronous>, transform_indices = @transform_7, window_bounds = array<i64: 128, 1>}, {pipeline_mode = #tpu.pipeline_mode<synchronous>, transform_indices = @transform_8, window_bounds = array<i64: 128, 128>}, {pipeline_mode = #tpu.pipeline_mode<synchronous>, transform_indices = @transform_9, window_bounds = array<i64: 128, 1>}, {pipeline_mode = #tpu.pipeline_mode<synchronous>, transform_indices = @transform_10, window_bounds = array<i64: 128, 128>}, {pipeline_mode = #tpu.pipeline_mode<synchronous>, transform_indices = @transform_11, window_bounds = array<i64: 128, 1>}, {transform_indices = @transform_12, window_bounds = array<i64: 1, 128, 1>}]} {
    %c0_i32 = arith.constant 0 : i32
    %0 = arith.cmpi eq, %arg1, %c0_i32 : i32
    %1 = arith.extui %0 : i1 to i32
    %c0_i32_0 = arith.constant 0 : i32
    %2 = arith.cmpi ne, %1, %c0_i32_0 : i32
    scf.if %2 {
      %cst_33 = arith.constant 0.000000e+00 : f32
      %50 = vector.broadcast %cst_33 : f32 to vector<128x1xf32>
      %c0_34 = arith.constant 0 : index
      %c0_35 = arith.constant 0 : index
      %51 = vector.load %arg15[%c0_34, %c0_35] : memref<128x1xf32, #tpu.memory_space<vmem>>, vector<128x1xf32>
      tpu.vector_store %arg15[%c0_34, %c0_35], %50 {strides = array<i32>} : memref<128x1xf32, #tpu.memory_space<vmem>>, vector<128x1xf32>,
    } else {
    }
    %c0 = arith.constant 0 : index
    %c0_1 = arith.constant 0 : index
    %c0_2 = arith.constant 0 : index
    %3 = vector.load %arg2[%c0, %c0_1, %c0_2] : memref<1x8x16xbf16, #tpu.memory_space<vmem>>, vector<1x8x16xbf16>
    %4 = vector.shape_cast %3 : vector<1x8x16xbf16> to vector<8x16xbf16>
    %c0_3 = arith.constant 0 : index
    %c0_4 = arith.constant 0 : index
    %5 = vector.load %arg4[%c0_3, %c0_4] : memref<128x8xbf16, #tpu.memory_space<vmem>>, vector<128x8xbf16>
    %cst = arith.constant dense<0.000000e+00> : vector<128x16xf32>
    %6 = tpu.matmul %5, %4, %cst {dimension_numbers = #tpu.dot_dimension_numbers<[1], [0], [0], [1], [0, 0, 1, 1], [], []>} : vector<128x8xbf16>, vector<8x16xbf16>, vector<128x16xf32> -> vector<128x16xf32>
    %c0_5 = arith.constant 0 : index
    %c0_6 = arith.constant 0 : index
    %7 = vector.load %arg5[%c0_5, %c0_6] : memref<128x1xf32, #tpu.memory_space<vmem>>, vector<128x1xf32>
    %8 = vector.broadcast %7 : vector<128x1xf32> to vector<128x16xf32>
    %9 = arith.addf %6, %8 : vector<128x16xf32>
    %cst_7 = arith.constant 0.000000e+00 : f32
    %10 = vector.broadcast %cst_7 : f32 to vector<128x16xf32>
    %11 = arith.maximumf %9, %10 : vector<128x16xf32>
    %c0_8 = arith.constant 0 : index
    %c0_9 = arith.constant 0 : index
    %12 = vector.load %arg6[%c0_8, %c0_9] : memref<128x128xbf16, #tpu.memory_space<vmem>>, vector<128x128xbf16>
    %13 = arith.truncf %11 : vector<128x16xf32> to vector<128x16xbf16>
    %cst_10 = arith.constant dense<0.000000e+00> : vector<128x16xf32>
    %14 = tpu.matmul %12, %13, %cst_10 {dimension_numbers = #tpu.dot_dimension_numbers<[1], [0], [0], [1], [0, 0, 1, 1], [], []>} : vector<128x128xbf16>, vector<128x16xbf16>, vector<128x16xf32> -> vector<128x16xf32>
    %c0_11 = arith.constant 0 : index
    %c0_12 = arith.constant 0 : index
    %15 = vector.load %arg7[%c0_11, %c0_12] : memref<128x1xf32, #tpu.memory_space<vmem>>, vector<128x1xf32>
    %16 = vector.broadcast %15 : vector<128x1xf32> to vector<128x16xf32>
    %17 = arith.addf %14, %16 : vector<128x16xf32>
    %cst_13 = arith.constant 0.000000e+00 : f32
    %18 = vector.broadcast %cst_13 : f32 to vector<128x16xf32>
    %19 = arith.maximumf %17, %18 : vector<128x16xf32>
    %c0_14 = arith.constant 0 : index
    %c0_15 = arith.constant 0 : index
    %20 = vector.load %arg8[%c0_14, %c0_15] : memref<128x128xbf16, #tpu.memory_space<vmem>>, vector<128x128xbf16>
    %21 = arith.truncf %19 : vector<128x16xf32> to vector<128x16xbf16>
    %cst_16 = arith.constant dense<0.000000e+00> : vector<128x16xf32>
    %22 = tpu.matmul %20, %21, %cst_16 {dimension_numbers = #tpu.dot_dimension_numbers<[1], [0], [0], [1], [0, 0, 1, 1], [], []>} : vector<128x128xbf16>, vector<128x16xbf16>, vector<128x16xf32> -> vector<128x16xf32>
    %c0_17 = arith.constant 0 : index
    %c0_18 = arith.constant 0 : index
    %23 = vector.load %arg9[%c0_17, %c0_18] : memref<128x1xf32, #tpu.memory_space<vmem>>, vector<128x1xf32>
    %24 = vector.broadcast %23 : vector<128x1xf32> to vector<128x16xf32>
    %25 = arith.addf %22, %24 : vector<128x16xf32>
    %cst_19 = arith.constant 0.000000e+00 : f32
    %26 = vector.broadcast %cst_19 : f32 to vector<128x16xf32>
    %27 = arith.maximumf %25, %26 : vector<128x16xf32>
    %c0_20 = arith.constant 0 : index
    %c0_21 = arith.constant 0 : index
    %28 = vector.load %arg10[%c0_20, %c0_21] : memref<128x128xbf16, #tpu.memory_space<vmem>>, vector<128x128xbf16>
    %29 = arith.truncf %27 : vector<128x16xf32> to vector<128x16xbf16>
    %cst_22 = arith.constant dense<0.000000e+00> : vector<128x16xf32>
    %30 = tpu.matmul %28, %29, %cst_22 {dimension_numbers = #tpu.dot_dimension_numbers<[1], [0], [0], [1], [0, 0, 1, 1], [], []>} : vector<128x128xbf16>, vector<128x16xbf16>, vector<128x16xf32> -> vector<128x16xf32>
    %c0_23 = arith.constant 0 : index
    %c0_24 = arith.constant 0 : index
    %31 = vector.load %arg11[%c0_23, %c0_24] : memref<128x1xf32, #tpu.memory_space<vmem>>, vector<128x1xf32>
    %32 = vector.broadcast %31 : vector<128x1xf32> to vector<128x16xf32>
    %33 = arith.addf %30, %32 : vector<128x16xf32>
    %c16_i32 = arith.constant 16 : i32
    %34 = arith.muli %arg1, %c16_i32 : i32
    %35 = tpu.iota {dimensions = array<i32: 1>} : vector<128x16xi32>
    %36 = vector.broadcast %34 : i32 to vector<128x16xi32>
    %37 = arith.addi %36, %35 : vector<128x16xi32>
    %c13_i32 = arith.constant 13 : i32
    %38 = vector.broadcast %c13_i32 : i32 to vector<128x16xi32>
    %39 = arith.cmpi slt, %37, %38 : vector<128x16xi32>
    %cst_25 = arith.constant 0.000000e+00 : f32
    %40 = vector.broadcast %cst_25 : f32 to vector<128x16xf32>
    %41 = arith.select %39, %33, %40 : vector<128x16xi1>, vector<128x16xf32>
    %c0_26 = arith.constant 0 : index
    %c0_27 = arith.constant 0 : index
    %42 = vector.load %arg15[%c0_26, %c0_27] : memref<128x1xf32, #tpu.memory_space<vmem>>, vector<128x1xf32>
    %cst_28 = arith.constant dense<0.000000e+00> : vector<128xf32>
    %43 = vector.multi_reduction <add>, %41, %cst_28 [1] : vector<128x16xf32> to vector<128xf32>
    %44 = vector.shape_cast %43 : vector<128xf32> to vector<128x1xf32>
    %45 = arith.addf %42, %44 : vector<128x1xf32>
    %c0_29 = arith.constant 0 : index
    %c0_30 = arith.constant 0 : index
    %46 = vector.load %arg15[%c0_29, %c0_30] : memref<128x1xf32, #tpu.memory_space<vmem>>, vector<128x1xf32>
    tpu.vector_store %arg15[%c0_29, %c0_30], %45 {strides = array<i32>} : memref<128x1xf32, #tpu.memory_space<vmem>>, vector<128x1xf32>,
    %c0_i32_31 = arith.constant 0 : i32
    %47 = arith.cmpi eq, %arg1, %c0_i32_31 : i32
    %48 = arith.extui %47 : i1 to i32
    %c0_i32_32 = arith.constant 0 : i32
    %49 = arith.cmpi ne, %48, %c0_i32_32 : i32
    scf.if %49 {
      %c0_33 = arith.constant 0 : index
      %c0_34 = arith.constant 0 : index
      %50 = vector.load %arg15[%c0_33, %c0_34] : memref<128x1xf32, #tpu.memory_space<vmem>>, vector<128x1xf32>
      %51 = arith.index_cast %arg0 : i32 to index
      %c0_35 = arith.constant 0 : index
      %52 = memref.load %arg3[%51, %c0_35] : memref<2x1xf32, #tpu.memory_space<smem>>
      %53 = vector.broadcast %52 : f32 to vector<128x1xf32>
      %54 = arith.mulf %50, %53 : vector<128x1xf32>
      %55 = vector.shape_cast %54 : vector<128x1xf32> to vector<128x1xf32>
      %56 = vector.broadcast %55 : vector<128x1xf32> to vector<128x8xf32>
      %57 = arith.truncf %56 : vector<128x8xf32> to vector<128x8xbf16>
      %c0_36 = arith.constant 0 : index
      %c0_37 = arith.constant 0 : index
      %58 = vector.load %arg12[%c0_36, %c0_37] : memref<128x128xbf16, #tpu.memory_space<vmem>>, vector<128x128xbf16>
      %cst_38 = arith.constant dense<0.000000e+00> : vector<128x8xf32>
      %59 = tpu.matmul %58, %57, %cst_38 {dimension_numbers = #tpu.dot_dimension_numbers<[1], [0], [0], [1], [0, 0, 1, 1], [], []>} : vector<128x128xbf16>, vector<128x8xbf16>, vector<128x8xf32> -> vector<128x8xf32>
      %60 = vector.extract_strided_slice %59 {offsets = [0, 0], sizes = [128, 1], strides = [1, 1]} : vector<128x8xf32> to vector<128x1xf32>
      %c0_39 = arith.constant 0 : index
      %c0_40 = arith.constant 0 : index
      %61 = vector.load %arg13[%c0_39, %c0_40] : memref<128x1xf32, #tpu.memory_space<vmem>>, vector<128x1xf32>
      %62 = arith.addf %60, %61 : vector<128x1xf32>
      %63 = vector.shape_cast %62 : vector<128x1xf32> to vector<1x128x1xf32>
      %c0_41 = arith.constant 0 : index
      %c0_42 = arith.constant 0 : index
      %c0_43 = arith.constant 0 : index
      %64 = vector.load %arg14[%c0_41, %c0_42, %c0_43] : memref<1x128x1xf32, #tpu.memory_space<vmem>>, vector<1x128x1xf32>
      tpu.vector_store %arg14[%c0_41, %c0_42, %c0_43], %63 {strides = array<i32>} : memref<1x128x1xf32, #tpu.memory_space<vmem>>, vector<1x128x1xf32>,
    } else {
    }
    return
  }
  func.func @transform_0(%arg0: i32, %arg1: i32) -> (i32, i32, i32) {
    %c0_i32 = arith.constant 0 : i32
    %c0_i32_0 = arith.constant 0 : i32
    return %arg0, %c0_i32, %arg1 : i32, i32, i32
  }
  func.func @transform_1(%arg0: i32, %arg1: i32) -> (i32, i32) {
    %c0_i32 = arith.constant 0 : i32
    %c0_i32_0 = arith.constant 0 : i32
    %c0_i32_1 = arith.constant 0 : i32
    return %c0_i32, %c0_i32_0 : i32, i32
  }
  func.func @transform_2(%arg0: i32, %arg1: i32) -> (i32, i32) {
    %c0_i32 = arith.constant 0 : i32
    %c0_i32_0 = arith.constant 0 : i32
    %c0_i32_1 = arith.constant 0 : i32
    return %c0_i32, %c0_i32_0 : i32, i32
  }
  func.func @transform_3(%arg0: i32, %arg1: i32) -> (i32, i32) {
    %c0_i32 = arith.constant 0 : i32
    %c0_i32_0 = arith.constant 0 : i32
    %c0_i32_1 = arith.constant 0 : i32
    return %c0_i32, %c0_i32_0 : i32, i32
  }
  func.func @transform_4(%arg0: i32, %arg1: i32) -> (i32, i32) {
    %c0_i32 = arith.constant 0 : i32
    %c0_i32_0 = arith.constant 0 : i32
    %c0_i32_1 = arith.constant 0 : i32
    return %c0_i32, %c0_i32_0 : i32, i32
  }
  func.func @transform_5(%arg0: i32, %arg1: i32) -> (i32, i32) {
    %c0_i32 = arith.constant 0 : i32
    %c0_i32_0 = arith.constant 0 : i32
    %c0_i32_1 = arith.constant 0 : i32
    return %c0_i32, %c0_i32_0 : i32, i32
  }
  func.func @transform_6(%arg0: i32, %arg1: i32) -> (i32, i32) {
    %c0_i32 = arith.constant 0 : i32
    %c0_i32_0 = arith.constant 0 : i32
    %c0_i32_1 = arith.constant 0 : i32
    return %c0_i32, %c0_i32_0 : i32, i32
  }
  func.func @transform_7(%arg0: i32, %arg1: i32) -> (i32, i32) {
    %c0_i32 = arith.constant 0 : i32
    %c0_i32_0 = arith.constant 0 : i32
    %c0_i32_1 = arith.constant 0 : i32
    return %c0_i32, %c0_i32_0 : i32, i32
  }
  func.func @transform_8(%arg0: i32, %arg1: i32) -> (i32, i32) {
    %c0_i32 = arith.constant 0 : i32
    %c0_i32_0 = arith.constant 0 : i32
    %c0_i32_1 = arith.constant 0 : i32
    return %c0_i32, %c0_i32_0 : i32, i32
  }
  func.func @transform_9(%arg0: i32, %arg1: i32) -> (i32, i32) {
    %c0_i32 = arith.constant 0 : i32
    %c0_i32_0 = arith.constant 0 : i32
    %c0_i32_1 = arith.constant 0 : i32
    return %c0_i32, %c0_i32_0 : i32, i32
  }
  func.func @transform_10(%arg0: i32, %arg1: i32) -> (i32, i32) {
    %c0_i32 = arith.constant 0 : i32
    %c0_i32_0 = arith.constant 0 : i32
    %c0_i32_1 = arith.constant 0 : i32
    return %c0_i32, %c0_i32_0 : i32, i32
  }
  func.func @transform_11(%arg0: i32, %arg1: i32) -> (i32, i32) {
    %c0_i32 = arith.constant 0 : i32
    %c0_i32_0 = arith.constant 0 : i32
    %c0_i32_1 = arith.constant 0 : i32
    return %c0_i32, %c0_i32_0 : i32, i32
  }
  func.func @transform_12(%arg0: i32, %arg1: i32) -> (i32, i32, i32) {
    %c0_i32 = arith.constant 0 : i32
    %c0_i32_0 = arith.constant 0 : i32
    %c0_i32_1 = arith.constant 0 : i32
    return %arg0, %c0_i32, %c0_i32_0 : i32, i32, i32
  }
}

</mosaic_0001>

<bundles_post_ra>
// kernel: tpu_custom_call.1
= control target key start
LH: loop header
LB: loop body
LE: loop exit
PB: predicated region body
PF: predicated region fallthrough
CT: control target
= control target key end

     0   :  { %17 = vsyncpa [#allocation4], 0  ;;  %s2302_s21 = smov 0   ;;  %s2304_s22 = smov 0   ;;  %s2878_s0 = inlined_call_operand.vmem [shape: bf16[2,8,16], index: 0, kind: input, shape index: {}]   ;;  %s2879_s1 = inlined_call_operand.vmem [shape: f32[2,1], index: 1, kind: input, shape index: {}]   ;;  %s2880_s2 = inlined_call_operand.vmem [shape: bf16[128,8], index: 2, kind: input, shape index: {}]   ;;  %s2881_s3 = inlined_call_operand.vmem [shape: f32[128,1], index: 3, kind: input, shape index: {}]   ;;  %s2882_s4 = inlined_call_operand.vmem [shape: bf16[128,128], index: 4, kind: input, shape index: {}]   ;;  %s2883_s5 = inlined_call_operand.vmem [shape: f32[128,1], index: 5, kind: input, shape index: {}]   ;;  %s2884_s6 = inlined_call_operand.vmem [shape: bf16[128,128], index: 6, kind: input, shape index: {}]   ;;  %s2885_s7 = inlined_call_operand.vmem [shape: f32[128,1], index: 7, kind: input, shape index: {}]   ;;  %s2886_s8 = inlined_call_operand.vmem [shape: bf16[128,128], index: 8, kind: input, shape index: {}]   ;;  %s2887_s9 = inlined_call_operand.vmem [shape: f32[128,1], index: 9, kind: input, shape index: {}]   ;;  %s2888_s10 = inlined_call_operand.vmem [shape: bf16[128,128], index: 10, kind: input, shape index: {}]   ;;  %s2889_s11 = inlined_call_operand.vmem [shape: f32[128,1], index: 11, kind: input, shape index: {}]   ;;  %s2890_s12 = inlined_call_operand.vmem [shape: f32[2,128,1], index: 12, kind: output, shape index: {}]  }
   0x1   :  { %s2306_s23 = smov 0  }
   0x2 LB: > { %s1886_s24 = sadd.s32 4294967295, %s2232_s23   ;;  %s35_s25 = sadd.s32 1, %s2228_s22  ;;  %s2232_s23 = sphi %s2306_s23, %s23_s23   ;;  %s2228_s22 = sphi %s2304_s22, %s2892_s22   ;;  %s2224_s21 = sphi %s2302_s21, %s2891_s21  }
   0x3   : > { %p37_p0 = scmp.ge.s32.totalorder %s35_s25, 2  ;;  %p1888_p1 = scmp.ge.s32.totalorder %s2232_s23, 1 }
   0x4   : > { %p325_p2 = scmp.lt.s32.totalorder %s2232_s23, 3  ;;  %p2119_p4 = scmp.eq.s32.totalorder %s1886_s24, 0 }
   0x5   : > { %s2894_s25 = smov (%p37_p0, %s35_s25), 0  ;;  %s337_s28 = sshll.u32 %s2879_s1, 4  ;;  %s338_s28 = int_to_ptr.vmem [resolvable:$true] %s337_s28 }
   0x6   : > { %p326_p3 = pnand %p1888_p1, %p325_p2  ;;  %s2234_s29 = smov [#allocation3]  }
   0x8   : > { %p2115_p5 = pneg %p326_p3  ;;  %390 = sbr.rel (%p326_p3) target bundleno = 1590 (0x636), region = 68 }
   0xa   : > { %p2116_p6 = pnand %p2119_p4, %p2115_p5 }
   0xc   : > { %2118 = dma.vmem_to_smem (!%p2116_p6), %s338_s28, 32, %s2234_s29, [#allocation4]  }
   0xd   : > { %2219 = dma.done.wait (%p2119_p4), [#allocation4], 32  }
   0xe   : > { %2221 = vsyncadd (%p2119_p4), [#allocation4], 4294967264 }
   0xf   : > { %397 = sfence }
  0x10   : > { %v501_v0 = vld [vmem:[%s2881_s3 + $0x70] sm:$0xff]  ;;  %v499_v1 = vld [vmem:[%s2881_s3 + $0x60] sm:$0xff]  ;;  %p436_p7 = scmp.lt.s32.totalorder %s2224_s21, 1  ;;  %v2235_v3 = vmov 0   ;;  %vm648_vm0 = vcmask 1043456   ;;  %v502_v6 = vld [vmem:[%s2881_s3 + $0x78] sm:$0xff] }
  0x11   : > { %v497_v2 = vld [vmem:[%s2881_s3 + $0x50] sm:$0xff]  ;;  %2150 = vset.pattern.permute.xlu2 %v2235_v3  ;;  %2149 = vset.pattern.permute.xlu1 %v2235_v3  ;;  %v500_v7 = vld [vmem:[%s2881_s3 + $0x68] sm:$0xff]  ;;  %v498_v8 = vld [vmem:[%s2881_s3 + $0x58] sm:$0xff]  ;;  %vm623_vm1 = vcmask 64512   ;;  %vm1438_vm3 = vcmask 130048   ;;  %vm453_vm4 = vcmask 7168  }
  0x12   : > { %2148 = vset.pattern.permute.xlu0 %v2235_v3  ;;  %565 = vperm.xlu1 %2149, %v499_v1   ;;  %s2337_s18 = scalar_select %p436_p7, %s2224_s21, 1  ;;  %v2072_v9 = vld [vmem:[%s2880_s2 + $0x20] sm:$0xff]  ;;  %v2070_v11 = vld [vmem:[%s2880_s2 + $0x10] sm:$0xff]  ;;  %v2075_v12 = vld [vmem:[%s2880_s2 + $0x38] sm:$0xff] }
  0x13   : > { %575 = vperm.xlu0 %2148, %v501_v0   ;;  %555 = vperm.xlu2 %2150, %v497_v2   ;;  %v2068_v10 = vld [vmem:[%s2880_s2] sm:$0xff]  ;;  %v496_v13 = vld [vmem:[%s2881_s3 + $0x48] sm:$0xff]  ;;  %v493_v15 = vld [vmem:[%s2881_s3 + $0x30] sm:$0xff]  ;;  %s2032_s13 = sshll.u32 %s2224_s21, 7 }
  0x14   : > { %s1893_s19 = sshll.u32 %s2337_s18, 2  ;;  %v495_v14 = vld [vmem:[%s2881_s3 + $0x40] sm:$0xff]  ;;  %v494_v16 = vld [vmem:[%s2881_s3 + $0x38] sm:$0xff]  ;;  %v492_v18 = vld [vmem:[%s2881_s3 + $0x28] sm:$0xff]  ;;  %s1540_s14 = sld [smem:[#allocation3 + %s2032_s13]] }
  0x15   : > { %s442_s26 = scalar_lea.vmem %s2878_s0, %s1893_s19  ;;  %v491_v17 = vld [vmem:[%s2881_s3 + $0x20] sm:$0xff]  ;;  %v2073_v19 = vld [vmem:[%s2880_s2 + $0x28] sm:$0xff]  ;;  %v2071_v21 = vld [vmem:[%s2880_s2 + $0x18] sm:$0xff]  ;;  %s2067_s16 = sshll.u32 %s2337_s18, 7 }
  0x16   : > { %v470_v4 = vld [vmem:[%s442_s26] sm:$0xf]  ;;  %v2069_v20 = vld [vmem:[%s2880_s2 + $0x8] sm:$0xff]  ;;  %v490_v22 = vld [vmem:[%s2881_s3 + $0x18] sm:$0xff]  ;;  %s2790_s26 = scalar_lea.vmem %s2890_s12, %s2067_s16 }
  0x17   : > { %v650_v5 = vsel %vm648_vm0, %v470_v4, 0  ;;  %v489_v23 = vld [vmem:[%s2881_s3 + $0x10] sm:$0xff]  ;;  %v487_v24 = vld [vmem:[%s2881_s3] sm:$0xff]  ;;  %v488_v26 = vld [vmem:[%s2881_s3 + $0x8] sm:$0xff] }
  0x18   : > { %2109 = vmatpush.bf16.msra.mxu2 %v650_v5  ;;  %659 = vmatpush.bf16.msra.mxu0 %v650_v5  ;;  %v755_v25 = vld [vmem:[%s2883_s5 + $0x70] sm:$0xff]  ;;  %v756_v27 = vld [vmem:[%s2883_s5 + $0x78] sm:$0xff]  ;;  %v754_v29 = vld [vmem:[%s2883_s5 + $0x68] sm:$0xff] }
  0x19   : > { %2108 = vmatpush.bf16.msra.mxu1 %v650_v5  ;;  %2110 = vmatpush.bf16.msra.mxu3 %v650_v5  ;;  %v2074_v28 = vld [vmem:[%s2880_s2 + $0x30] sm:$0xff]  ;;  %v753_v30 = vld [vmem:[%s2883_s5 + $0x60] sm:$0xff]  ;;  %v752_v33 = vld [vmem:[%s2883_s5 + $0x58] sm:$0xff] }
  0x1a   : > { %570 = vperm.xlu1 %2149, %v500_v7   ;;  %v751_v31 = vld [vmem:[%s2883_s5 + $0x50] sm:$0xff]  ;;  %v749_v32 = vld [vmem:[%s2883_s5 + $0x40] sm:$0xff]  ;;  %v750_v34 = vld [vmem:[%s2883_s5 + $0x48] sm:$0xff] }
  0x1b   : > { %580 = vperm.xlu0 %2148, %v502_v6   ;;  %560 = vperm.xlu2 %2150, %v498_v8   ;;  %v748_v35 = vld [vmem:[%s2883_s5 + $0x38] sm:$0xff]  ;;  %v747_v36 = vld [vmem:[%s2883_s5 + $0x30] sm:$0xff]  ;;  %v745_v37 = vld [vmem:[%s2883_s5 + $0x20] sm:$0xff] }
  0x1c   : > { %1932 = vmatmul.msk.bf16.vlgmr.msra.gmra.mxu2 %vm623_vm1, %v2072_v9  ;;  %1928 = vmatmul.msk.bf16.vlgmr.msra.gmra.mxu0 %vm623_vm1, %v2068_v10  ;;  %v743_v38 = vld [vmem:[%s2883_s5 + $0x10] sm:$0xff]  ;;  %v746_v39 = vld [vmem:[%s2883_s5 + $0x28] sm:$0xff]  ;;  %v744_v40 = vld [vmem:[%s2883_s5 + $0x18] sm:$0xff] }
  0x1d   : > { %1930 = vmatmul.msk.bf16.vlgmr.msra.gmra.mxu1 %vm623_vm1, %v2070_v11  ;;  %1935 = vmatmul.msk.bf16.vlgmr.msra.gmra.mxu3 %vm623_vm1, %v2075_v12  ;;  %v742_v41 = vld [vmem:[%s2883_s5 + $0x8] sm:$0xff]  ;;  %v741_v42 = vld [vmem:[%s2883_s5] sm:$0xff]  ;;  %v988_v43 = vld [vmem:[%s2885_s7 + $0x70] sm:$0xff] }
  0x1e   : > { %v986_v44 = vld [vmem:[%s2885_s7 + $0x60] sm:$0xff]  ;;  %v989_v45 = vld [vmem:[%s2885_s7 + $0x78] sm:$0xff]  ;;  %v987_v46 = vld [vmem:[%s2885_s7 + $0x68] sm:$0xff] }
  0x1f   : > { %v985_v47 = vld [vmem:[%s2885_s7 + $0x58] sm:$0xff]  ;;  %v984_v48 = vld [vmem:[%s2885_s7 + $0x50] sm:$0xff]  ;;  %v982_v49 = vld [vmem:[%s2885_s7 + $0x40] sm:$0xff] }
  0x20   : > { %v980_v50 = vld [vmem:[%s2885_s7 + $0x30] sm:$0xff]  ;;  %v983_v51 = vld [vmem:[%s2885_s7 + $0x48] sm:$0xff]  ;;  %v981_v52 = vld [vmem:[%s2885_s7 + $0x38] sm:$0xff] }
  0x21   : > { %v979_v53 = vld [vmem:[%s2885_s7 + $0x28] sm:$0xff]  ;;  %v978_v54 = vld [vmem:[%s2885_s7 + $0x20] sm:$0xff]  ;;  %v976_v55 = vld [vmem:[%s2885_s7 + $0x10] sm:$0xff] }
  0x22   : > { %550 = vperm.xlu1 %2149, %v496_v13   ;;  %v974_v56 = vld [vmem:[%s2885_s7] sm:$0xff]  ;;  %v977_v57 = vld [vmem:[%s2885_s7 + $0x18] sm:$0xff]  ;;  %v975_v58 = vld [vmem:[%s2885_s7 + $0x8] sm:$0xff] }
  0x23   : > { %545 = vperm.xlu0 %2148, %v495_v14   ;;  %535 = vperm.xlu2 %2150, %v493_v15   ;;  %v1222_v59 = vld [vmem:[%s2887_s9 + $0x78] sm:$0xff]  ;;  %v1221_v60 = vld [vmem:[%s2887_s9 + $0x70] sm:$0xff]  ;;  %v1219_v61 = vld [vmem:[%s2887_s9 + $0x60] sm:$0xff] }
  0x24   : > { %v1217_v62 = vld [vmem:[%s2887_s9 + $0x50] sm:$0xff]  ;;  %v1220_v63 = vld [vmem:[%s2887_s9 + $0x68] sm:$0xff]  ;;  %v1218_v0 = vld [vmem:[%s2887_s9 + $0x58] sm:$0xff] }
  0x25   : > { %v1216_v3 = vld [vmem:[%s2887_s9 + $0x48] sm:$0xff]  ;;  %v1215_v4 = vld [vmem:[%s2887_s9 + $0x40] sm:$0xff]  ;;  %v1213_v5 = vld [vmem:[%s2887_s9 + $0x30] sm:$0xff] }
  0x26   : > { %v1211_v9 = vld [vmem:[%s2887_s9 + $0x20] sm:$0xff]  ;;  %v1214_v11 = vld [vmem:[%s2887_s9 + $0x38] sm:$0xff]  ;;  %v1212_v12 = vld [vmem:[%s2887_s9 + $0x28] sm:$0xff] }
  0x2a   : > { %525 = vperm.xlu1 %2149, %v491_v17  }
  0x2b   : > { %540 = vperm.xlu0 %2148, %v494_v16   ;;  %530 = vperm.xlu2 %2150, %v492_v18  }
  0x2c   : > { %1933 = vmatmul.msk.bf16.gmra.mxu2 %vm623_vm1, %v2073_v19  ;;  %1929 = vmatmul.msk.bf16.gmra.mxu0 %vm623_vm1, %v2069_v20 }
  0x2d   : > { %1931 = vmatmul.msk.bf16.gmra.mxu1 %vm623_vm1, %v2071_v21  ;;  %v1210_v21 = vld [vmem:[%s2887_s9 + $0x18] sm:$0xff] }
  0x32   : > { %520 = vperm.xlu1 %2149, %v490_v22   ;;  %v1209_v22 = vld [vmem:[%s2887_s9 + $0x10] sm:$0xff] }
  0x33   : > { %515 = vperm.xlu0 %2148, %v489_v23   ;;  %505 = vperm.xlu2 %2150, %v487_v24   ;;  %v1207_v23 = vld [vmem:[%s2887_s9] sm:$0xff] }
  0x3a   : > { %829 = vperm.xlu1 %2149, %v755_v25  }
  0x3b   : > { %510 = vperm.xlu0 %2148, %v488_v26   ;;  %834 = vperm.xlu2 %2150, %v756_v27   ;;  %v1208_v27 = vld [vmem:[%s2887_s9 + $0x8] sm:$0xff] }
  0x3c   : > { %1934 = vmatmul.msk.bf16.gmra.mxu2 %vm623_vm1, %v2074_v28 }
  0x42   : > { %824 = vperm.xlu1 %2149, %v754_v29  }
  0x43   : > { %819 = vperm.xlu0 %2148, %v753_v30   ;;  %809 = vperm.xlu2 %2150, %v751_v31  }
  0x4a   : > { %799 = vperm.xlu1 %2149, %v749_v32  }
  0x4b   : > { %814 = vperm.xlu0 %2148, %v752_v33   ;;  %804 = vperm.xlu2 %2150, %v750_v34  }
  0x52   : > { %794 = vperm.xlu1 %2149, %v748_v35  }
  0x53   : > { %789 = vperm.xlu0 %2148, %v747_v36   ;;  %779 = vperm.xlu2 %2150, %v745_v37  }
  0x5a   : > { %769 = vperm.xlu1 %2149, %v743_v38  }
  0x5b   : > { %784 = vperm.xlu0 %2148, %v746_v39   ;;  %774 = vperm.xlu2 %2150, %v744_v40  }
  0x62   : > { %764 = vperm.xlu1 %2149, %v742_v41  }
  0x63   : > { %759 = vperm.xlu0 %2148, %v741_v42   ;;  %1062 = vperm.xlu2 %2150, %v988_v43  }
  0x6a   : > { %1052 = vperm.xlu1 %2149, %v986_v44  }
  0x6b   : > { %1067 = vperm.xlu0 %2148, %v989_v45   ;;  %1057 = vperm.xlu2 %2150, %v987_v46  }
  0x6d   : > { %v556_v24 = vpop.permute.xlu2 %555 }
  0x72   : > { %1047 = vperm.xlu1 %2149, %v985_v47  }
  0x73   : > { %1042 = vperm.xlu0 %2148, %v984_v48   ;;  %1032 = vperm.xlu2 %2150, %v982_v49  }
  0x75   : > { %v561_v30 = vpop.permute.xlu2 %560 }
  0x7a   : > { %1022 = vperm.xlu1 %2149, %v980_v50  }
  0x7b   : > { %1037 = vperm.xlu0 %2148, %v983_v51   ;;  %1027 = vperm.xlu2 %2150, %v981_v52  }
  0x7d   : > { %v536_v36 = vpop.permute.xlu2 %535 }
  0x82   : > { %1017 = vperm.xlu1 %2149, %v979_v53  }
  0x83   : > { %1012 = vperm.xlu0 %2148, %v978_v54   ;;  %1002 = vperm.xlu2 %2150, %v976_v55  }
  0x84   : > { %v566_v18 = vpop.permute.xlu1 %565 }
  0x85   : > { %v576_v1 = vpop.permute.xlu0 %575  ;;  %v531_v53 = vpop.permute.xlu2 %530 }
  0x8a   : > { %992 = vperm.xlu1 %2149, %v974_v56  }
  0x8b   : > { %1007 = vperm.xlu0 %2148, %v977_v57   ;;  %997 = vperm.xlu2 %2150, %v975_v58  }
  0x8c   : > { %v571_v28 = vpop.permute.xlu1 %570 }
  0x8d   : > { %v581_v10 = vpop.permute.xlu0 %580 }
  0x92   : > { %1300 = vperm.xlu1 %2149, %v1222_v59  }
  0x93   : > { %1295 = vperm.xlu0 %2148, %v1221_v60   ;;  %1285 = vperm.xlu2 %2150, %v1219_v61  }
  0x94   : > { %v551_v34 = vpop.permute.xlu1 %550 }
  0x95   : > { %v546_v31 = vpop.permute.xlu0 %545 }
  0x99   : > { %v661_v25 = vpop.f32.mrf.mxu0 }
  0x9a   : > { %1275 = vperm.xlu1 %2149, %v1217_v62   ;;  %v671_v19 = vpop.f32.mrf.mxu1 }
  0x9b   : > { %1290 = vperm.xlu0 %2148, %v1220_v63   ;;  %1280 = vperm.xlu2 %2150, %v1218_v0  }
  0x9c   : > { %v526_v49 = vpop.permute.xlu1 %525 }
  0x9d   : > { %v541_v38 = vpop.permute.xlu0 %540  ;;  %v672_v60 = vadd.f32 %v671_v19, %v526_v49  ;;  %v2076_v19 = vld [vmem:[%s2882_s4] sm:$0xff] }
  0x9f   : > { %v681_v2 = vpop.f32.mrf.mxu2 }
  0xa0   : > { %v696_v6 = vpop.f32.mrf.mxu3  ;;  %v682_v51 = vadd.f32 %v681_v2, %v546_v31  ;;  %v2083_v31 = vld [vmem:[%s2882_s4 + $0x38] sm:$0xff] }
  0xa1   : > { %v697_v7 = vadd.f32 %v696_v6, %v576_v1  ;;  %v663_v33 = vpop.f32.mrf.mxu0 }
  0xa2   : > { %1270 = vperm.xlu1 %2149, %v1216_v3   ;;  %v673_v29 = vpop.f32.mrf.mxu1  ;;  %v709_v59 = vmax.f32 %v682_v51, 0.0  ;;  %v705_v3 = vmax.f32 %v672_v60, 0.0 }
  0xa3   : > { %1265 = vperm.xlu0 %2148, %v1215_v4   ;;  %1255 = vperm.xlu2 %2150, %v1213_v5   ;;  %v715_v14 = vmax.f32 %v697_v7, 0.0  ;;  %v674_v61 = vadd.f32 %v673_v29, %v531_v53 }
  0xa4   : > { %v521_v4 = vpop.permute.xlu1 %520 }
  0xa5   : > { %v516_v58 = vpop.permute.xlu0 %515  ;;  %v706_v2 = vmax.f32 %v674_v61, 0.0 }
  0xa7   : > { %v683_v8 = vpop.f32.mrf.mxu2 }
  0xa8   : > { %v698_v13 = vpop.f32.mrf.mxu3  ;;  %v684_v46 = vadd.f32 %v683_v8, %v551_v34  ;;  %v506_v8 = vpop.permute.xlu2 %505 }
  0xa9   : > { %v699_v15 = vadd.f32 %v698_v13, %v581_v10  ;;  %v666_v45 = vpop.f32.mrf.mxu0 }
  0xaa   : > { %1245 = vperm.xlu1 %2149, %v1211_v9   ;;  %v676_v35 = vpop.f32.mrf.mxu1  ;;  %v710_v54 = vmax.f32 %v684_v46, 0.0  ;;  %v667_v5 = vadd.f32 %v666_v45, %v516_v58  ;;  %v662_v9 = vadd.f32 %v661_v25, %v506_v8 }
  0xab   : > { %1260 = vperm.xlu0 %2148, %v1214_v11   ;;  %1250 = vperm.xlu2 %2150, %v1212_v12   ;;  %v716_v16 = vmax.f32 %v699_v15, 0.0  ;;  %v677_v55 = vadd.f32 %v676_v35, %v536_v36 }
  0xac   : > { %v737_v0 = vpack.c.bf16 %v710_v54, %v709_v59  ;;  %v703_v12 = vmax.f32 %v667_v5, 0.0  ;;  %v701_v15 = vmax.f32 %v662_v9, 0.0  ;;  %v830_v25 = vpop.permute.xlu1 %829 }
  0xad   : > { %v740_v17 = vpack.c.bf16 %v716_v16, %v715_v14  ;;  %v707_v62 = vmax.f32 %v677_v55, 0.0  ;;  %v511_v10 = vpop.permute.xlu0 %510  ;;  %v735_v14 = vpack.c.bf16 %v706_v2, %v705_v3 }
  0xae   : > { %v664_v11 = vadd.f32 %v663_v33, %v511_v10 }
  0xaf   : > { %v686_v20 = vpop.f32.mrf.mxu2  ;;  %885 = vmatpush.bf16.msrb.mxu1 %v740_v17 }
  0xb0   : > { %v687_v42 = vadd.f32 %v686_v20, %v556_v24  ;;  %v702_v16 = vmax.f32 %v664_v11, 0.0  ;;  %v2077_v20 = vld [vmem:[%s2882_s4 + $0x8] sm:$0xff] }
  0xb1   : > { %v668_v1 = vpop.f32.mrf.mxu0  ;;  %v2081_v24 = vld [vmem:[%s2882_s4 + $0x28] sm:$0xff] }
  0xb2   : > { %1240 = vperm.xlu1 %2149, %v1210_v21   ;;  %v678_v50 = vpop.f32.mrf.mxu1  ;;  %v711_v52 = vmax.f32 %v687_v42, 0.0  ;;  %v669_v6 = vadd.f32 %v668_v1, %v521_v4  ;;  %v2078_v21 = vld [vmem:[%s2882_s4 + $0x10] sm:$0xff] }
  0xb3   : > { %1235 = vperm.xlu0 %2148, %v1209_v22   ;;  %1225 = vperm.xlu2 %2150, %v1207_v23   ;;  %v679_v56 = vadd.f32 %v678_v50, %v541_v38  ;;  %v2079_v22 = vld [vmem:[%s2882_s4 + $0x18] sm:$0xff]  ;;  %v2080_v23 = vld [vmem:[%s2882_s4 + $0x20] sm:$0xff] }
  0xb4   : > { %v704_v13 = vmax.f32 %v669_v6, 0.0 }
  0xb5   : > { %v708_v63 = vmax.f32 %v679_v56, 0.0 }
  0xb6   : > { %v734_v17 = vpack.c.bf16 %v704_v13, %v703_v12 }
  0xb7   : > { %v688_v26 = vpop.f32.mrf.mxu2  ;;  %v736_v7 = vpack.c.bf16 %v708_v63, %v707_v62 }
  0xb8   : > { %v689_v40 = vadd.f32 %v688_v26, %v561_v30  ;;  %v820_v26 = vpop.permute.xlu0 %819 }
  0xba   : > { %v712_v47 = vmax.f32 %v689_v40, 0.0 }
  0xbb   : > { %1230 = vperm.xlu0 %2148, %v1208_v27   ;;  %v2082_v27 = vld [vmem:[%s2882_s4 + $0x30] sm:$0xff] }
  0xbc   : > { %v738_v57 = vpack.c.bf16 %v712_v47, %v711_v52 }
  0xbf   : > { %v691_v32 = vpop.f32.mrf.mxu2 }
  0xc0   : > { %v692_v37 = vadd.f32 %v691_v32, %v566_v18  ;;  %v733_v18 = vpack.c.bf16 %v702_v16, %v701_v15  ;;  %v815_v29 = vpop.permute.xlu0 %814  ;;  %v835_v32 = vpop.permute.xlu2 %834 }
  0xc2   : > { %v713_v43 = vmax.f32 %v692_v37, 0.0 }
  0xc7   : > { %v693_v39 = vpop.f32.mrf.mxu2 }
  0xc8   : > { %v694_v41 = vadd.f32 %v693_v39, %v571_v28  ;;  %v825_v28 = vpop.permute.xlu1 %824  ;;  %v790_v33 = vpop.permute.xlu0 %789 }
  0xc9   : > { %v810_v35 = vpop.permute.xlu2 %809 }
  0xca   : > { %v714_v44 = vmax.f32 %v694_v41, 0.0 }
  0xcc   : > { %v739_v48 = vpack.c.bf16 %v714_v44, %v713_v43 }
  0xce   : > { %886 = vmatpush.bf16.msrb.mxu1 %v739_v48 }
  0xd0   : > { %v2579_v30 = vpop.permute.xlu1 %799  ;;  %v785_v36 = vpop.permute.xlu0 %784 }
  0xd1   : > { %v805_v39 = vpop.permute.xlu2 %804 }
  0xd2   : > { %887 = vmatpush.bf16.msrb.mxu1 %v738_v57 }
  0xd6   : > { %888 = vmatpush.bf16.msrb.mxu1 %v737_v0 }
  0xd8   : > { %v795_v34 = vpop.permute.xlu1 %794  ;;  %v760_v40 = vpop.permute.xlu0 %759 }
  0xd9   : > { %v780_v48 = vpop.permute.xlu2 %779 }
  0xda   : > { %889 = vmatpush.bf16.msrb.mxu1 %v736_v7 }
  0xde   : > { %890 = vmatpush.bf16.msrb.mxu1 %v735_v14 }
  0xe0   : > { %v770_v37 = vpop.permute.xlu1 %769 }
  0xe1   : > { %v775_v51 = vpop.permute.xlu2 %774 }
  0xe2   : > { %891 = vmatpush.bf16.msrb.mxu1 %v734_v17 }
  0xe6   : > { %892 = vmatpush.bf16.msrb.mxu1 %v733_v18 }
  0xe8   : > { %v765_v42 = vpop.permute.xlu1 %764 }
  0xe9   : > { %893 = vmatmul.bf16.vlgmr.msrb.gmra.mxu1 %v2076_v19 }
  0xf9   : > { %898 = vmatmul.bf16.gmra.mxu1 %v2077_v20 }
 0x109   : > { %903 = vmatmul.bf16.gmra.mxu1 %v2078_v21 }
 0x119   : > { %908 = vmatmul.bf16.gmra.mxu1 %v2079_v22 }
 0x129   : > { %913 = vmatmul.bf16.gmra.mxu1 %v2080_v23 }
 0x139   : > { %918 = vmatmul.bf16.gmra.mxu1 %v2081_v24 }
 0x149   : > { %923 = vmatmul.bf16.gmra.mxu1 %v2082_v27 }
 0x159   : > { %928 = vmatmul.bf16.gmra.mxu1 %v2083_v31 }
 0x166   : > { %v894_v38 = vpop.f32.mrf.mxu1 }
 0x167   : > { %v895_v41 = vadd.f32 %v894_v38, %v760_v40  ;;  %v2089_v40 = vld [vmem:[%s2884_s6 + $0x28] sm:$0xff] }
 0x169   : > { %v934_v45 = vmax.f32 %v895_v41, 0.0  ;;  %v1063_v41 = vpop.permute.xlu2 %1062 }
 0x16e   : > { %v896_v43 = vpop.f32.mrf.mxu1 }
 0x16f   : > { %v897_v44 = vadd.f32 %v896_v43, %v765_v42  ;;  %v2090_v42 = vld [vmem:[%s2884_s6 + $0x30] sm:$0xff]  ;;  %v1053_v43 = vpop.permute.xlu1 %1052 }
 0x171   : > { %v935_v46 = vmax.f32 %v897_v44, 0.0  ;;  %v1058_v44 = vpop.permute.xlu2 %1057 }
 0x173   : > { %v966_v47 = vpack.c.bf16 %v935_v46, %v934_v45  ;;  %v2091_v46 = vld [vmem:[%s2884_s6 + $0x38] sm:$0xff] }
 0x176   : > { %v899_v49 = vpop.f32.mrf.mxu1 }
 0x177   : > { %v900_v50 = vadd.f32 %v899_v49, %v770_v37  ;;  %v1048_v45 = vpop.permute.xlu1 %1047 }
 0x179   : > { %v936_v54 = vmax.f32 %v900_v50, 0.0 }
 0x17e   : > { %v901_v52 = vpop.f32.mrf.mxu1 }
 0x17f   : > { %v902_v53 = vadd.f32 %v901_v52, %v775_v51  ;;  %v1023_v49 = vpop.permute.xlu1 %1022 }
 0x181   : > { %v937_v55 = vmax.f32 %v902_v53, 0.0 }
 0x183   : > { %v967_v56 = vpack.c.bf16 %v937_v55, %v936_v54 }
 0x186   : > { %v904_v57 = vpop.f32.mrf.mxu1 }
 0x187   : > { %v905_v58 = vadd.f32 %v904_v57, %v780_v48  ;;  %v1068_v48 = vpop.permute.xlu0 %1067  ;;  %v1018_v52 = vpop.permute.xlu1 %1017 }
 0x189   : > { %v938_v61 = vmax.f32 %v905_v58, 0.0 }
 0x18e   : > { %v906_v59 = vpop.f32.mrf.mxu1 }
 0x18f   : > { %v907_v60 = vadd.f32 %v906_v59, %v785_v36  ;;  %v1043_v51 = vpop.permute.xlu0 %1042 }
 0x191   : > { %v939_v62 = vmax.f32 %v907_v60, 0.0 }
 0x193   : > { %v968_v63 = vpack.c.bf16 %v939_v62, %v938_v61 }
 0x196   : > { %v909_v0 = vpop.f32.mrf.mxu1 }
 0x197   : > { %v910_v1 = vadd.f32 %v909_v0, %v790_v33  ;;  %v1038_v55 = vpop.permute.xlu0 %1037 }
 0x199   : > { %v940_v2 = vmax.f32 %v910_v1, 0.0 }
 0x19e   : > { %v911_v3 = vpop.f32.mrf.mxu1 }
 0x19f   : > { %v912_v4 = vadd.f32 %v911_v3, %v795_v34  ;;  %v1013_v0 = vpop.permute.xlu0 %1012 }
 0x1a1   : > { %v941_v5 = vmax.f32 %v912_v4, 0.0 }
 0x1a3   : > { %v969_v6 = vpack.c.bf16 %v941_v5, %v940_v2 }
 0x1a6   : > { %v914_v7 = vpop.f32.mrf.mxu1 }
 0x1a7   : > { %v915_v36 = vadd.f32 %v914_v7, %v2579_v30  ;;  %v2085_v30 = vld [vmem:[%s2884_s6 + $0x8] sm:$0xff]  ;;  %v1008_v4 = vpop.permute.xlu0 %1007 }
 0x1ae   : > { %v916_v8 = vpop.f32.mrf.mxu1 }
 0x1af   : > { %v917_v31 = vadd.f32 %v916_v8, %v805_v39  ;;  %v2088_v39 = vld [vmem:[%s2884_s6 + $0x20] sm:$0xff] }
 0x1b6   : > { %v919_v9 = vpop.f32.mrf.mxu1 }
 0x1b7   : > { %v920_v24 = vadd.f32 %v919_v9, %v810_v35  ;;  %v2087_v35 = vld [vmem:[%s2884_s6 + $0x18] sm:$0xff] }
 0x1b9   : > { %v944_v37 = vmax.f32 %v920_v24, 0.0 }
 0x1be   : > { %v921_v10 = vpop.f32.mrf.mxu1 }
 0x1bf   : > { %v922_v21 = vadd.f32 %v921_v10, %v815_v29  ;;  %v2084_v29 = vld [vmem:[%s2884_s6] sm:$0xff] }
 0x1c1   : > { %v945_v33 = vmax.f32 %v922_v21, 0.0 }
 0x1c3   : > { %v971_v38 = vpack.c.bf16 %v945_v33, %v944_v37 }
 0x1c6   : > { %v924_v11 = vpop.f32.mrf.mxu1 }
 0x1c7   : > { %v925_v18 = vadd.f32 %v924_v11, %v820_v26 }
 0x1c9   : > { %v946_v27 = vmax.f32 %v925_v18, 0.0 }
 0x1ce   : > { %v926_v12 = vpop.f32.mrf.mxu1 }
 0x1cf   : > { %v927_v16 = vadd.f32 %v926_v12, %v825_v28  ;;  %v942_v28 = vmax.f32 %v915_v36, 0.0 }
 0x1d1   : > { %v947_v22 = vmax.f32 %v927_v16, 0.0 }
 0x1d3   : > { %v972_v34 = vpack.c.bf16 %v947_v22, %v946_v27 }
 0x1d6   : > { %v929_v13 = vpop.f32.mrf.mxu1 }
 0x1d7   : > { %v930_v14 = vadd.f32 %v929_v13, %v830_v25  ;;  %v943_v25 = vmax.f32 %v917_v31, 0.0 }
 0x1d9   : > { %v948_v19 = vmax.f32 %v930_v14, 0.0  ;;  %v970_v26 = vpack.c.bf16 %v943_v25, %v942_v28 }
 0x1de   : > { %v931_v15 = vpop.f32.mrf.mxu1 }
 0x1df   : > { %v932_v17 = vadd.f32 %v931_v15, %v835_v32  ;;  %v2086_v32 = vld [vmem:[%s2884_s6 + $0x10] sm:$0xff] }
 0x1e1   : > { %v949_v20 = vmax.f32 %v932_v17, 0.0 }
 0x1e3   : > { %v973_v23 = vpack.c.bf16 %v949_v20, %v948_v19 }
 0x1e5   : > { %1118 = vmatpush.bf16.msrb.mxu2 %v973_v23 }
 0x1e9   : > { %1119 = vmatpush.bf16.msrb.mxu2 %v972_v34 }
 0x1ed   : > { %1120 = vmatpush.bf16.msrb.mxu2 %v971_v38 }
 0x1f1   : > { %1121 = vmatpush.bf16.msrb.mxu2 %v970_v26 }
 0x1f5   : > { %1122 = vmatpush.bf16.msrb.mxu2 %v969_v6 }
 0x1f9   : > { %1123 = vmatpush.bf16.msrb.mxu2 %v968_v63 }
 0x1fd   : > { %1124 = vmatpush.bf16.msrb.mxu2 %v967_v56  ;;  %v993_v56 = vpop.permute.xlu1 %992 }
 0x201   : > { %1125 = vmatpush.bf16.msrb.mxu2 %v966_v47  ;;  %v2609_v47 = vpop.permute.xlu2 %1032 }
 0x204   : > { %1126 = vmatmul.bf16.vlgmr.msrb.gmra.mxu2 %v2084_v29 }
 0x209   : > { %v1028_v50 = vpop.permute.xlu2 %1027 }
 0x211   : > { %v1003_v53 = vpop.permute.xlu2 %1002 }
 0x214   : > { %1131 = vmatmul.bf16.gmra.mxu2 %v2085_v30 }
 0x219   : > { %v998_v58 = vpop.permute.xlu2 %997 }
 0x224   : > { %1136 = vmatmul.bf16.gmra.mxu2 %v2086_v32 }
 0x234   : > { %1141 = vmatmul.bf16.gmra.mxu2 %v2087_v35 }
 0x244   : > { %1146 = vmatmul.bf16.gmra.mxu2 %v2088_v39 }
 0x254   : > { %1151 = vmatmul.bf16.gmra.mxu2 %v2089_v40 }
 0x264   : > { %1156 = vmatmul.bf16.gmra.mxu2 %v2090_v42 }
 0x274   : > { %1161 = vmatmul.bf16.gmra.mxu2 %v2091_v46 }
 0x287   : > { %v1127_v54 = vpop.f32.mrf.mxu2 }
 0x288   : > { %v1128_v57 = vadd.f32 %v1127_v54, %v993_v56  ;;  %v2097_v56 = vld [vmem:[%s2886_s8 + $0x28] sm:$0xff] }
 0x28a   : > { %v1167_v61 = vmax.f32 %v1128_v57, 0.0  ;;  %v2098_v57 = vld [vmem:[%s2886_s8 + $0x30] sm:$0xff] }
 0x28f   : > { %v1129_v59 = vpop.f32.mrf.mxu2 }
 0x290   : > { %v1130_v60 = vadd.f32 %v1129_v59, %v998_v58  ;;  %v2099_v58 = vld [vmem:[%s2886_s8 + $0x38] sm:$0xff] }
 0x292   : > { %v1168_v62 = vmax.f32 %v1130_v60, 0.0 }
 0x294   : > { %v1199_v63 = vpack.c.bf16 %v1168_v62, %v1167_v61 }
 0x297   : > { %v1132_v1 = vpop.f32.mrf.mxu2 }
 0x298   : > { %v1133_v3 = vadd.f32 %v1132_v1, %v1003_v53 }
 0x29a   : > { %v1169_v6 = vmax.f32 %v1133_v3, 0.0 }
 0x29f   : > { %v1134_v2 = vpop.f32.mrf.mxu2 }
 0x2a0   : > { %v1135_v5 = vadd.f32 %v1134_v2, %v1008_v4 }
 0x2a2   : > { %v1170_v7 = vmax.f32 %v1135_v5, 0.0  ;;  %v1401_v5 = vlaneseq }
 0x2a4   : > { %v1200_v8 = vpack.c.bf16 %v1170_v7, %v1169_v6  ;;  %v2648_v7 = vand.u32 127, %v1401_v5 }
 0x2a6   : > { %vm1405_vm2 = vcmp.lt.s32.totalorder %v2648_v7, 13 }
 0x2a7   : > { %v1137_v9 = vpop.f32.mrf.mxu2 }
 0x2a8   : > { %v1138_v10 = vadd.f32 %v1137_v9, %v1013_v0  ;;  %v1286_v0 = vpop.permute.xlu2 %1285 }
 0x2aa   : > { %v1171_v13 = vmax.f32 %v1138_v10, 0.0 }
 0x2af   : > { %v1139_v11 = vpop.f32.mrf.mxu2 }
 0x2b0   : > { %v1140_v12 = vadd.f32 %v1139_v11, %v1018_v52  ;;  %v1281_v4 = vpop.permute.xlu2 %1280 }
 0x2b2   : > { %v1172_v14 = vmax.f32 %v1140_v12, 0.0  ;;  %v2653_v12 = vpop.permute.xlu1 %1300 }
 0x2b4   : > { %v1201_v15 = vpack.c.bf16 %v1172_v14, %v1171_v13 }
 0x2b7   : > { %v1142_v16 = vpop.f32.mrf.mxu2 }
 0x2b8   : > { %v1143_v17 = vadd.f32 %v1142_v16, %v1023_v49 }
 0x2ba   : > { %v1173_v20 = vmax.f32 %v1143_v17, 0.0 }
 0x2bf   : > { %v1144_v18 = vpop.f32.mrf.mxu2 }
 0x2c0   : > { %v1145_v19 = vadd.f32 %v1144_v18, %v1028_v50 }
 0x2c2   : > { %v1174_v21 = vmax.f32 %v1145_v19, 0.0  ;;  %v1276_v19 = vpop.permute.xlu1 %1275 }
 0x2c4   : > { %v1202_v22 = vpack.c.bf16 %v1174_v21, %v1173_v20 }
 0x2c7   : > { %v1147_v23 = vpop.f32.mrf.mxu2 }
 0x2c8   : > { %v1148_v52 = vadd.f32 %v1147_v23, %v2609_v47  ;;  %v2093_v47 = vld [vmem:[%s2886_s8 + $0x8] sm:$0xff] }
 0x2cf   : > { %v1149_v24 = vpop.f32.mrf.mxu2 }
 0x2d0   : > { %v1150_v46 = vadd.f32 %v1149_v24, %v1038_v55  ;;  %v2096_v55 = vld [vmem:[%s2886_s8 + $0x20] sm:$0xff]  ;;  %v1271_v24 = vpop.permute.xlu1 %1270 }
 0x2d7   : > { %v1152_v27 = vpop.f32.mrf.mxu2 }
 0x2d8   : > { %v1153_v40 = vadd.f32 %v1152_v27, %v1043_v51  ;;  %v2095_v51 = vld [vmem:[%s2886_s8 + $0x18] sm:$0xff] }
 0x2da   : > { %v1177_v53 = vmax.f32 %v1153_v40, 0.0 }
 0x2df   : > { %v1154_v31 = vpop.f32.mrf.mxu2 }
 0x2e0   : > { %v1155_v32 = vadd.f32 %v1154_v31, %v1048_v45  ;;  %v2092_v45 = vld [vmem:[%s2886_s8] sm:$0xff] }
 0x2e2   : > { %v1178_v49 = vmax.f32 %v1155_v32, 0.0 }
 0x2e4   : > { %v1204_v54 = vpack.c.bf16 %v1178_v49, %v1177_v53 }
 0x2e7   : > { %v1157_v33 = vpop.f32.mrf.mxu2 }
 0x2e8   : > { %v1158_v26 = vadd.f32 %v1157_v33, %v1053_v43 }
 0x2ea   : > { %v1179_v42 = vmax.f32 %v1158_v26, 0.0 }
 0x2ef   : > { %v1159_v34 = vpop.f32.mrf.mxu2 }
 0x2f0   : > { %v1160_v38 = vadd.f32 %v1159_v34, %v1058_v44  ;;  %v1175_v44 = vmax.f32 %v1148_v52, 0.0 }
 0x2f2   : > { %v1180_v35 = vmax.f32 %v1160_v38, 0.0 }
 0x2f4   : > { %v1205_v50 = vpack.c.bf16 %v1180_v35, %v1179_v42 }
 0x2f7   : > { %v1162_v36 = vpop.f32.mrf.mxu2 }
 0x2f8   : > { %v1163_v37 = vadd.f32 %v1162_v36, %v1063_v41  ;;  %v1176_v41 = vmax.f32 %v1150_v46, 0.0 }
 0x2fa   : > { %v1181_v29 = vmax.f32 %v1163_v37, 0.0  ;;  %v1203_v43 = vpack.c.bf16 %v1176_v41, %v1175_v44 }
 0x2ff   : > { %v1164_v25 = vpop.f32.mrf.mxu2 }
 0x300   : > { %v1165_v28 = vadd.f32 %v1164_v25, %v1068_v48  ;;  %v2094_v48 = vld [vmem:[%s2886_s8 + $0x10] sm:$0xff] }
 0x302   : > { %v1182_v30 = vmax.f32 %v1165_v28, 0.0 }
 0x304   : > { %v1206_v39 = vpack.c.bf16 %v1182_v30, %v1181_v29 }
 0x306   : > { %1351 = vmatpush.bf16.msrb.mxu3 %v1206_v39 }
 0x30a   : > { %1352 = vmatpush.bf16.msrb.mxu3 %v1205_v50 }
 0x30e   : > { %1353 = vmatpush.bf16.msrb.mxu3 %v1204_v54 }
 0x312   : > { %1354 = vmatpush.bf16.msrb.mxu3 %v1203_v43 }
 0x316   : > { %1355 = vmatpush.bf16.msrb.mxu3 %v1202_v22 }
 0x31a   : > { %1356 = vmatpush.bf16.msrb.mxu3 %v1201_v15 }
 0x31e   : > { %1357 = vmatpush.bf16.msrb.mxu3 %v1200_v8  ;;  %v1256_v8 = vpop.permute.xlu2 %1255 }
 0x322   : > { %1358 = vmatpush.bf16.msrb.mxu3 %v1199_v63  ;;  %v2642_v63 = vpop.permute.xlu0 %1295 }
 0x325   : > { %1359 = vmatmul.bf16.vlgmr.msrb.gmra.mxu3 %v2092_v45  ;;  %v2236_v45 = vmov 0.0  }
 0x326   : > { %460 = vst.msk [vmem:[#allocation2 + $0x30] sm:$0xff] %vm453_vm4, %v2236_v45 }
 0x327   : > { %454 = vst.msk [vmem:[#allocation2] sm:$0xff] %vm453_vm4, %v2236_v45 }
 0x328   : > { %455 = vst.msk [vmem:[#allocation2 + $0x8] sm:$0xff] %vm453_vm4, %v2236_v45 }
 0x329   : > { %456 = vst.msk [vmem:[#allocation2 + $0x10] sm:$0xff] %vm453_vm4, %v2236_v45 }
 0x32a   : > { %v1291_v3 = vpop.permute.xlu0 %1290  ;;  %457 = vst.msk [vmem:[#allocation2 + $0x18] sm:$0xff] %vm453_vm4, %v2236_v45 }
 0x32b   : > { %458 = vst.msk [vmem:[#allocation2 + $0x20] sm:$0xff] %vm453_vm4, %v2236_v45 }
 0x32c   : > { %459 = vst.msk [vmem:[#allocation2 + $0x28] sm:$0xff] %vm453_vm4, %v2236_v45 }
 0x32d   : > { %461 = vst.msk [vmem:[#allocation2 + $0x38] sm:$0xff] %vm453_vm4, %v2236_v45 }
 0x32e   : > { %462 = vst.msk [vmem:[#allocation2 + $0x40] sm:$0xff] %vm453_vm4, %v2236_v45 }
 0x32f   : > { %463 = vst.msk [vmem:[#allocation2 + $0x48] sm:$0xff] %vm453_vm4, %v2236_v45 }
 0x330   : > { %464 = vst.msk [vmem:[#allocation2 + $0x50] sm:$0xff] %vm453_vm4, %v2236_v45 }
 0x331   : > { %465 = vst.msk [vmem:[#allocation2 + $0x58] sm:$0xff] %vm453_vm4, %v2236_v45 }
 0x332   : > { %v1266_v6 = vpop.permute.xlu0 %1265  ;;  %466 = vst.msk [vmem:[#allocation2 + $0x60] sm:$0xff] %vm453_vm4, %v2236_v45 }
 0x333   : > { %467 = vst.msk [vmem:[#allocation2 + $0x68] sm:$0xff] %vm453_vm4, %v2236_v45 }
 0x334   : > { %468 = vst.msk [vmem:[#allocation2 + $0x70] sm:$0xff] %vm453_vm4, %v2236_v45 }
 0x335   : > { %1364 = vmatmul.bf16.gmra.mxu3 %v2093_v47  ;;  %469 = vst.msk [vmem:[#allocation2 + $0x78] sm:$0xff] %vm453_vm4, %v2236_v45 }
 0x336   : > { %v1431_v7 = vld [vmem:[#allocation2 + $0x48] sm:$0xff] }
 0x33a   : > { %v1261_v14 = vpop.permute.xlu0 %1260 }
 0x342   : > { %v1236_v39 = vpop.permute.xlu0 %1235 }
 0x345   : > { %1369 = vmatmul.bf16.gmra.mxu3 %v2094_v48 }
 0x34a   : > { %v1231_v41 = vpop.permute.xlu0 %1230 }
 0x355   : > { %1374 = vmatmul.bf16.gmra.mxu3 %v2095_v51 }
 0x365   : > { %1379 = vmatmul.bf16.gmra.mxu3 %v2096_v55  ;;  %v1246_v55 = vpop.permute.xlu1 %1245 }
 0x375   : > { %1384 = vmatmul.bf16.gmra.mxu3 %v2097_v56 }
 0x385   : > { %1389 = vmatmul.bf16.gmra.mxu3 %v2098_v57 }
 0x395   : > { %1394 = vmatmul.bf16.gmra.mxu3 %v2099_v58 }
 0x3a8   : > { %v2636_v59 = vpop.f32.mrf.mxu3 }
 0x3b0   : > { %v2638_v60 = vpop.f32.mrf.mxu3 }
 0x3b1   : > { %v1363_v43 = vadd.f32 %v2638_v60, %v1231_v41 }
 0x3b3   : > { %v1407_v51 = vsel %vm1405_vm2, %v1363_v43, 0.0 }
 0x3b4   : > { %v1442_v58 = vsel %vm1438_vm3, %v1407_v51, 0.0 }
 0x3b8   : > { %v1365_v61 = vpop.f32.mrf.mxu3 }
 0x3b9   : > { %v1366_v46 = vadd.f32 %v1365_v61, %v1236_v39 }
 0x3bb   : > { %v1408_v52 = vsel %vm1405_vm2, %v1366_v46, 0.0  ;;  %v1424_v46 = vld [vmem:[#allocation2 + $0x10] sm:$0xff] }
 0x3bc   : > { %v1445_v44 = vsel %vm1438_vm3, %v1408_v52, 0.0 }
 0x3c0   : > { %v2640_v62 = vpop.f32.mrf.mxu3 }
 0x3c8   : > { %v2644_v1 = vpop.f32.mrf.mxu3 }
 0x3c9   : > { %v1371_v60 = vadd.f32 %v2644_v1, %v1246_v55 }
 0x3d0   : > { %v2646_v2 = vpop.f32.mrf.mxu3 }
 0x3d8   : > { %v1375_v9 = vpop.f32.mrf.mxu3 }
 0x3d9   : > { %v1376_v10 = vadd.f32 %v1375_v9, %v1256_v8 }
 0x3db   : > { %v1412_v11 = vsel %vm1405_vm2, %v1376_v10, 0.0 }
 0x3dc   : > { %v1457_v13 = vsel %vm1438_vm3, %v1412_v11, 0.0 }
 0x3dd   : > { %1458 = vadd.xlane.f32.xlu2 %v1457_v13 }
 0x3e0   : > { %v1377_v15 = vpop.f32.mrf.mxu3 }
 0x3e1   : > { %v1378_v16 = vadd.f32 %v1377_v15, %v1261_v14 }
 0x3e3   : > { %v1413_v17 = vsel %vm1405_vm2, %v1378_v16, 0.0  ;;  %v1428_v16 = vld [vmem:[#allocation2 + $0x30] sm:$0xff] }
 0x3e4   : > { %v1460_v18 = vsel %vm1438_vm3, %v1413_v17, 0.0 }
 0x3e5   : > { %1461 = vadd.xlane.f32.xlu0 %v1460_v18 }
 0x3e8   : > { %v1380_v20 = vpop.f32.mrf.mxu3 }
 0x3e9   : > { %v1381_v21 = vadd.f32 %v1380_v20, %v1266_v6 }
 0x3eb   : > { %v1414_v22 = vsel %vm1405_vm2, %v1381_v21, 0.0 }
 0x3ec   : > { %v1463_v23 = vsel %vm1438_vm3, %v1414_v22, 0.0 }
 0x3ed   : > { %1464 = vadd.xlane.f32.xlu0 %v1463_v23 }
 0x3f0   : > { %v1382_v27 = vpop.f32.mrf.mxu3 }
 0x3f1   : > { %v1383_v31 = vadd.f32 %v1382_v27, %v1271_v24 }
 0x3f3   : > { %v1415_v33 = vsel %vm1405_vm2, %v1383_v31, 0.0  ;;  %v1432_v31 = vld [vmem:[#allocation2 + $0x50] sm:$0xff] }
 0x3f4   : > { %v1466_v34 = vsel %vm1438_vm3, %v1415_v33, 0.0 }
 0x3f5   : > { %1467 = vadd.xlane.f32.xlu1 %v1466_v34 }
 0x3f8   : > { %v1385_v36 = vpop.f32.mrf.mxu3 }
 0x3f9   : > { %v1386_v37 = vadd.f32 %v1385_v36, %v1276_v19  ;;  %v1429_v19 = vld [vmem:[#allocation2 + $0x38] sm:$0xff] }
 0x3fa   : > { %v1433_v36 = vld [vmem:[#allocation2 + $0x58] sm:$0xff] }
 0x3fb   : > { %v1416_v25 = vsel %vm1405_vm2, %v1386_v37, 0.0 }
 0x3fc   : > { %v1469_v38 = vsel %vm1438_vm3, %v1416_v25, 0.0 }
 0x3fd   : > { %1470 = vadd.xlane.f32.xlu1 %v1469_v38  ;;  %v1434_v38 = vld [vmem:[#allocation2 + $0x60] sm:$0xff] }
 0x400   : > { %v1387_v28 = vpop.f32.mrf.mxu3 }
 0x401   : > { %v1388_v26 = vadd.f32 %v1387_v28, %v1281_v4  ;;  %v1241_v4 = vpop.permute.xlu1 %1240 }
 0x402   : > { %v1368_v8 = vadd.f32 %v2640_v62, %v1241_v4 }
 0x403   : > { %v1417_v29 = vsel %vm1405_vm2, %v1388_v26, 0.0 }
 0x404   : > { %v1472_v30 = vsel %vm1438_vm3, %v1417_v29, 0.0  ;;  %v1409_v11 = vsel %vm1405_vm2, %v1368_v8, 0.0 }
 0x405   : > { %1473 = vadd.xlane.f32.xlu2 %v1472_v30  ;;  %v1448_v14 = vsel %vm1438_vm3, %v1409_v11, 0.0 }
 0x408   : > { %v1390_v32 = vpop.f32.mrf.mxu3 }
 0x409   : > { %v1391_v35 = vadd.f32 %v1390_v32, %v1286_v0  ;;  %v1410_v0 = vsel %vm1405_vm2, %v1371_v60, 0.0  ;;  %v2731_v32 = vstv %s1540_s14 }
 0x40a   : > { %v1451_v6 = vsel %vm1438_vm3, %v1410_v0, 0.0 }
 0x40b   : > { %v1418_v40 = vsel %vm1405_vm2, %v1391_v35, 0.0 }
 0x40c   : > { %v1475_v42 = vsel %vm1438_vm3, %v1418_v40, 0.0 }
 0x40d   : > { %1476 = vadd.xlane.f32.xlu0 %v1475_v42  ;;  %v1435_v42 = vld [vmem:[#allocation2 + $0x68] sm:$0xff] }
 0x410   : > { %v1392_v49 = vpop.f32.mrf.mxu3 }
 0x411   : > { %v1393_v50 = vadd.f32 %v1392_v49, %v1291_v3  ;;  %v1251_v3 = vpop.permute.xlu2 %1250 }
 0x412   : > { %v1373_v9 = vadd.f32 %v2646_v2, %v1251_v3  ;;  %v1437_v3 = vld [vmem:[#allocation2 + $0x78] sm:$0xff] }
 0x413   : > { %v1419_v53 = vsel %vm1405_vm2, %v1393_v50, 0.0 }
 0x414   : > { %v1478_v54 = vsel %vm1438_vm3, %v1419_v53, 0.0  ;;  %v1411_v10 = vsel %vm1405_vm2, %v1373_v9, 0.0  ;;  %v1427_v9 = vld [vmem:[#allocation2 + $0x28] sm:$0xff] }
 0x415   : > { %1479 = vadd.xlane.f32.xlu2 %v1478_v54  ;;  %1446 = vadd.xlane.f32.xlu0 %v1445_v44  ;;  %v1454_v13 = vsel %vm1438_vm3, %v1411_v10, 0.0  ;;  %v1425_v10 = vld [vmem:[#allocation2 + $0x18] sm:$0xff] }
 0x418   : > { %v1395_v47 = vpop.f32.mrf.mxu3 }
 0x419   : > { %v1396_v48 = vadd.f32 %v1395_v47, %v2642_v63  ;;  %v1436_v47 = vld [vmem:[#allocation2 + $0x70] sm:$0xff] }
 0x41b   : > { %v1420_v56 = vsel %vm1405_vm2, %v1396_v48, 0.0  ;;  %v1423_v48 = vld [vmem:[#allocation2 + $0x8] sm:$0xff] }
 0x41c   : > { %v1481_v57 = vsel %vm1438_vm3, %v1420_v56, 0.0 }
 0x41d   : > { %1482 = vadd.xlane.f32.xlu1 %v1481_v57  ;;  %1443 = vadd.xlane.f32.xlu0 %v1442_v58 }
 0x420   : > { %v1397_v61 = vpop.f32.mrf.mxu3 }
 0x421   : > { %v1398_v63 = vadd.f32 %v1397_v61, %v2653_v12  ;;  %v1226_v12 = vpop.permute.xlu2 %1225 }
 0x422   : > { %v1361_v15 = vadd.f32 %v2636_v59, %v1226_v12  ;;  %v1430_v59 = vld [vmem:[#allocation2 + $0x40] sm:$0xff] }
 0x423   : > { %v1421_v1 = vsel %vm1405_vm2, %v1398_v63, 0.0 }
 0x424   : > { %v1484_v5 = vsel %vm1438_vm3, %v1421_v1, 0.0  ;;  %v1406_v62 = vsel %vm1405_vm2, %v1361_v15, 0.0  ;;  %v1426_v1 = vld [vmem:[#allocation2 + $0x20] sm:$0xff] }
 0x425   : > { %1485 = vadd.xlane.f32.xlu2 %v1484_v5  ;;  %1452 = vadd.xlane.f32.xlu1 %v1451_v6  ;;  %v1439_v2 = vsel %vm1438_vm3, %v1406_v62, 0.0 }
 0x42d   : > { %1455 = vadd.xlane.f32.xlu2 %v1454_v13  ;;  %1449 = vadd.xlane.f32.xlu1 %v1448_v14 }
 0x435   : > { %1440 = vadd.xlane.f32.xlu2 %v1439_v2 }
 0x450   : > { %v1459_v17 = vpop.xlane.xlu2 %1458 }
 0x451   : > { %v1493_v18 = vadd.f32 %v1459_v17, %v1428_v16 }
 0x453   : > { %1510 = vst.msk [vmem:[#allocation2 + $0x30] sm:$0xff] %vm453_vm4, %v1493_v18  ;;  %v1422_v18 = vld [vmem:[#allocation2] sm:$0xff] }
 0x458   : > { %v1462_v20 = vpop.xlane.xlu0 %1461 }
 0x459   : > { %v1494_v21 = vadd.f32 %v1462_v20, %v1429_v19 }
 0x45a   : > { %v1529_v53 = vld [vmem:[#allocation2 + $0x30] sm:$0xff] }
 0x45b   : > { %1511 = vst.msk [vmem:[#allocation2 + $0x38] sm:$0xff] %vm453_vm4, %v1494_v21  ;;  %v1548_v43 = vmul.f32 %v2731_v32, %v1529_v53 }
 0x460   : > { %v1465_v22 = vpop.xlane.xlu0 %1464 }
 0x461   : > { %v1495_v23 = vadd.f32 %v1465_v22, %v1430_v59 }
 0x462   : > { %v1530_v49 = vld [vmem:[#allocation2 + $0x38] sm:$0xff] }
 0x463   : > { %1512 = vst.msk [vmem:[#allocation2 + $0x40] sm:$0xff] %vm453_vm4, %v1495_v23  ;;  %v1549_v44 = vmul.f32 %v2731_v32, %v1530_v49 }
 0x465   : > { %v2171_v45 = vpack.i.bf16 %v1549_v44, %v1548_v43 }
 0x468   : > { %v1468_v24 = vpop.xlane.xlu1 %1467 }
 0x469   : > { %v1496_v27 = vadd.f32 %v1468_v24, %v1431_v7 }
 0x46a   : > { %v1531_v21 = vld [vmem:[#allocation2 + $0x40] sm:$0xff] }
 0x46b   : > { %1513 = vst.msk [vmem:[#allocation2 + $0x48] sm:$0xff] %vm453_vm4, %v1496_v27  ;;  %v1550_v24 = vmul.f32 %v2731_v32, %v1531_v21 }
 0x470   : > { %v1471_v33 = vpop.xlane.xlu1 %1470 }
 0x471   : > { %v1497_v34 = vadd.f32 %v1471_v33, %v1432_v31 }
 0x472   : > { %v1532_v19 = vld [vmem:[#allocation2 + $0x48] sm:$0xff] }
 0x473   : > { %1514 = vst.msk [vmem:[#allocation2 + $0x50] sm:$0xff] %vm453_vm4, %v1497_v34  ;;  %v1551_v23 = vmul.f32 %v2731_v32, %v1532_v19 }
 0x475   : > { %v2166_v33 = vpack.i.bf16 %v1551_v23, %v1550_v24  ;;  %v1762_v24 = vld [vmem:[%s2889_s11 + $0x18] sm:$0xff] }
 0x478   : > { %v1474_v37 = vpop.xlane.xlu2 %1473 }
 0x479   : > { %v1498_v25 = vadd.f32 %v1474_v37, %v1433_v36 }
 0x47a   : > { %v1533_v26 = vld [vmem:[#allocation2 + $0x50] sm:$0xff] }
 0x47b   : > { %1515 = vst.msk [vmem:[#allocation2 + $0x58] sm:$0xff] %vm453_vm4, %v1498_v25  ;;  %v1552_v35 = vmul.f32 %v2731_v32, %v1533_v26 }
 0x480   : > { %v1477_v28 = vpop.xlane.xlu0 %1476 }
 0x481   : > { %v1499_v29 = vadd.f32 %v1477_v28, %v1434_v38 }
 0x482   : > { %v1534_v30 = vld [vmem:[#allocation2 + $0x58] sm:$0xff] }
 0x483   : > { %1516 = vst.msk [vmem:[#allocation2 + $0x60] sm:$0xff] %vm453_vm4, %v1499_v29  ;;  %v1553_v39 = vmul.f32 %v2731_v32, %v1534_v30 }
 0x485   : > { %v2161_v40 = vpack.i.bf16 %v1553_v39, %v1552_v35 }
 0x487   : > { %2162 = vperm.xlu0 %2148, %v2161_v40  }
 0x488   : > { %v1480_v50 = vpop.xlane.xlu2 %1479  ;;  %v1447_v52 = vpop.xlane.xlu0 %1446 }
 0x489   : > { %v1500_v41 = vadd.f32 %v1480_v50, %v1435_v42  ;;  %v1489_v54 = vadd.f32 %v1447_v52, %v1424_v46 }
 0x48a   : > { %v1535_v56 = vld [vmem:[#allocation2 + $0x60] sm:$0xff] }
 0x48b   : > { %1517 = vst.msk [vmem:[#allocation2 + $0x68] sm:$0xff] %vm453_vm4, %v1500_v41  ;;  %v1554_v61 = vmul.f32 %v2731_v32, %v1535_v56 }
 0x48c   : > { %1506 = vst.msk [vmem:[#allocation2 + $0x10] sm:$0xff] %vm453_vm4, %v1489_v54 }
 0x48f   : > { %2172 = vperm.xlu0 %2148, %v2171_v45  }
 0x490   : > { %v1483_v51 = vpop.xlane.xlu1 %1482  ;;  %v1444_v55 = vpop.xlane.xlu0 %1443 }
 0x491   : > { %v1501_v57 = vadd.f32 %v1483_v51, %v1436_v47  ;;  %v1488_v58 = vadd.f32 %v1444_v55, %v1423_v48 }
 0x492   : > { %v1536_v60 = vld [vmem:[#allocation2 + $0x68] sm:$0xff] }
 0x493   : > { %1518 = vst.msk [vmem:[#allocation2 + $0x70] sm:$0xff] %vm453_vm4, %v1501_v57  ;;  %v1555_v63 = vmul.f32 %v2731_v32, %v1536_v60  ;;  %v1525_v37 = vld [vmem:[#allocation2 + $0x10] sm:$0xff] }
 0x494   : > { %1505 = vst.msk [vmem:[#allocation2 + $0x8] sm:$0xff] %vm453_vm4, %v1488_v58  ;;  %v1544_v26 = vmul.f32 %v2731_v32, %v1525_v37  ;;  %v1764_v37 = vld [vmem:[%s2889_s11 + $0x28] sm:$0xff] }
 0x495   : > { %v2156_v0 = vpack.i.bf16 %v1555_v63, %v1554_v61 }
 0x497   : > { %2157 = vperm.xlu2 %2150, %v2156_v0  }
 0x498   : > { %v1486_v4 = vpop.xlane.xlu2 %1485  ;;  %v1453_v5 = vpop.xlane.xlu1 %1452 }
 0x499   : > { %v1502_v6 = vadd.f32 %v1486_v4, %v1437_v3  ;;  %v1491_v8 = vadd.f32 %v1453_v5, %v1426_v1 }
 0x49a   : > { %v1537_v13 = vld [vmem:[#allocation2 + $0x70] sm:$0xff] }
 0x49b   : > { %1519 = vst.msk [vmem:[#allocation2 + $0x78] sm:$0xff] %vm453_vm4, %v1502_v6  ;;  %v1556_v2 = vmul.f32 %v2731_v32, %v1537_v13  ;;  %v1524_v25 = vld [vmem:[#allocation2 + $0x8] sm:$0xff]  ;;  %v2102_v13 = vld [vmem:[%s2888_s10 + $0x10] sm:$0xff] }
 0x49c   : > { %1508 = vst.msk [vmem:[#allocation2 + $0x20] sm:$0xff] %vm453_vm4, %v1491_v8  ;;  %v1543_v30 = vmul.f32 %v2731_v32, %v1524_v25 }
 0x4a0   : > { %v1456_v11 = vpop.xlane.xlu2 %1455  ;;  %v1450_v12 = vpop.xlane.xlu1 %1449 }
 0x4a1   : > { %v1492_v14 = vadd.f32 %v1456_v11, %v1427_v9  ;;  %v1490_v15 = vadd.f32 %v1450_v12, %v1425_v10  ;;  %v2100_v11 = vld [vmem:[%s2888_s10] sm:$0xff]  ;;  %v2101_v12 = vld [vmem:[%s2888_s10 + $0x8] sm:$0xff] }
 0x4a2   : > { %v1538_v62 = vld [vmem:[#allocation2 + $0x78] sm:$0xff] }
 0x4a3   : > { %1509 = vst.msk [vmem:[#allocation2 + $0x28] sm:$0xff] %vm453_vm4, %v1492_v14  ;;  %v1557_v16 = vmul.f32 %v2731_v32, %v1538_v62  ;;  %v1527_v59 = vld [vmem:[#allocation2 + $0x20] sm:$0xff]  ;;  %v2103_v14 = vld [vmem:[%s2888_s10 + $0x18] sm:$0xff]  ;;  %v2105_v62 = vld [vmem:[%s2888_s10 + $0x28] sm:$0xff] }
 0x4a4   : > { %1507 = vst.msk [vmem:[#allocation2 + $0x18] sm:$0xff] %vm453_vm4, %v1490_v15  ;;  %v1546_v27 = vmul.f32 %v2731_v32, %v1527_v59  ;;  %v2104_v15 = vld [vmem:[%s2888_s10 + $0x20] sm:$0xff] }
 0x4a5   : > { %v2151_v17 = vpack.i.bf16 %v1557_v16, %v1556_v2  ;;  %v2106_v2 = vld [vmem:[%s2888_s10 + $0x30] sm:$0xff]  ;;  %v2107_v16 = vld [vmem:[%s2888_s10 + $0x38] sm:$0xff] }
 0x4a7   : > { %2152 = vperm.xlu1 %2149, %v2151_v17   ;;  %v1759_v17 = vld [vmem:[%s2889_s11] sm:$0xff] }
 0x4a8   : > { %v1441_v20 = vpop.xlane.xlu2 %1440 }
 0x4a9   : > { %v1487_v22 = vadd.f32 %v1441_v20, %v1422_v18  ;;  %v1760_v20 = vld [vmem:[%s2889_s11 + $0x8] sm:$0xff] }
 0x4aa   : > { %v1528_v7 = vld [vmem:[#allocation2 + $0x28] sm:$0xff] }
 0x4ab   : > { %1504 = vst.msk [vmem:[#allocation2] sm:$0xff] %vm453_vm4, %v1487_v22  ;;  %v1547_v31 = vmul.f32 %v2731_v32, %v1528_v7  ;;  %v1526_v36 = vld [vmem:[#allocation2 + $0x18] sm:$0xff]  ;;  %v1761_v22 = vld [vmem:[%s2889_s11 + $0x10] sm:$0xff] }
 0x4ac   : > { %v1545_v38 = vmul.f32 %v2731_v32, %v1526_v36 }
 0x4ad   : > { %v2176_v34 = vpack.i.bf16 %v1547_v31, %v1546_v27 }
 0x4ae   : > { %v2181_v35 = vpack.i.bf16 %v1545_v38, %v1544_v26 }
 0x4af   : > { %2167 = vperm.xlu1 %2149, %v2166_v33   ;;  %2177 = vperm.xlu2 %2150, %v2176_v34   ;;  %v1763_v33 = vld [vmem:[%s2889_s11 + $0x20] sm:$0xff] }
 0x4b2   : > { %v1523_v28 = vld [vmem:[#allocation2] sm:$0xff] }
 0x4b3   : > { %v1542_v29 = vmul.f32 %v2731_v32, %v1523_v28  ;;  %v1765_v28 = vld [vmem:[%s2889_s11 + $0x30] sm:$0xff] }
 0x4b5   : > { %v2186_v39 = vpack.i.bf16 %v1543_v30, %v1542_v29  ;;  %v1766_v30 = vld [vmem:[%s2889_s11 + $0x38] sm:$0xff] }
 0x4b7   : > { %2182 = vperm.xlu1 %2149, %v2181_v35   ;;  %2187 = vperm.xlu0 %2148, %v2186_v39  }
 0x4f1   : > { %v2158_v40 = vpop.permute.xlu2 %2157 }
 0x4f2   : > { %v2160_v52 = vunpack.i.h.bf16 %v2158_v40  ;;  %v2159_v53 = vunpack.i.l.bf16 %v2158_v40  ;;  %v1767_v40 = vld [vmem:[%s2889_s11 + $0x40] sm:$0xff] }
 0x4f4   : > { %v1644_v43 = vpack.c.bf16 %v2160_v52, %v2159_v53  ;;  %v1769_v53 = vld [vmem:[%s2889_s11 + $0x50] sm:$0xff] }
 0x4f9   : > { %v2163_v50 = vpop.permute.xlu0 %2162 }
 0x4fa   : > { %v2165_v54 = vunpack.i.h.bf16 %v2163_v50  ;;  %v2164_v44 = vunpack.i.l.bf16 %v2163_v50 }
 0x4fc   : > { %v1643_v48 = vpack.c.bf16 %v2165_v54, %v2164_v44  ;;  %v1770_v44 = vld [vmem:[%s2889_s11 + $0x58] sm:$0xff] }
 0x501   : > { %v2173_v51 = vpop.permute.xlu0 %2172 }
 0x502   : > { %v2175_v55 = vunpack.i.h.bf16 %v2173_v51  ;;  %v2174_v56 = vunpack.i.l.bf16 %v2173_v51  ;;  %v1772_v51 = vld [vmem:[%s2889_s11 + $0x68] sm:$0xff] }
 0x504   : > { %v1641_v63 = vpack.c.bf16 %v2175_v55, %v2174_v56 }
 0x509   : > { %v2178_v58 = vpop.permute.xlu2 %2177 }
 0x50a   : > { %v2180_v60 = vunpack.i.h.bf16 %v2178_v58  ;;  %v2179_v61 = vunpack.i.l.bf16 %v2178_v58 }
 0x50c   : > { %v1640_v4 = vpack.c.bf16 %v2180_v60, %v2179_v61  ;;  %v1774_v61 = vld [vmem:[%s2889_s11 + $0x78] sm:$0xff] }
 0x519   : > { %v2153_v42 = vpop.permute.xlu1 %2152 }
 0x51a   : > { %v2155_v46 = vunpack.i.h.bf16 %v2153_v42  ;;  %v2154_v49 = vunpack.i.l.bf16 %v2153_v42 }
 0x51c   : > { %v1645_v41 = vpack.c.bf16 %v2155_v46, %v2154_v49  ;;  %v1768_v49 = vld [vmem:[%s2889_s11 + $0x48] sm:$0xff] }
 0x51e   : > { %1710 = vmatpush.bf16.msrb.mxu0 %v1645_v41 }
 0x521   : > { %v2168_v45 = vpop.permute.xlu1 %2167 }
 0x522   : > { %1711 = vmatpush.bf16.msrb.mxu0 %v1644_v43  ;;  %v2170_v47 = vunpack.i.h.bf16 %v2168_v45  ;;  %v2169_v32 = vunpack.i.l.bf16 %v2168_v45 }
 0x524   : > { %v1642_v57 = vpack.c.bf16 %v2170_v47, %v2169_v32  ;;  %v1771_v47 = vld [vmem:[%s2889_s11 + $0x60] sm:$0xff] }
 0x526   : > { %1712 = vmatpush.bf16.msrb.mxu0 %v1643_v48 }
 0x529   : > { %v2183_v0 = vpop.permute.xlu1 %2182  ;;  %v2188_v5 = vpop.permute.xlu0 %2187 }
 0x52a   : > { %1713 = vmatpush.bf16.msrb.mxu0 %v1642_v57  ;;  %v2185_v3 = vunpack.i.h.bf16 %v2183_v0  ;;  %v2184_v1 = vunpack.i.l.bf16 %v2183_v0  ;;  %v2190_v6 = vunpack.i.h.bf16 %v2188_v5  ;;  %v2189_v8 = vunpack.i.l.bf16 %v2188_v5  ;;  %v1773_v57 = vld [vmem:[%s2889_s11 + $0x70] sm:$0xff] }
 0x52c   : > { %v1639_v9 = vpack.c.bf16 %v2185_v3, %v2184_v1  ;;  %v1638_v10 = vpack.c.bf16 %v2190_v6, %v2189_v8 }
 0x52e   : > { %1714 = vmatpush.bf16.msrb.mxu0 %v1641_v63 }
 0x532   : > { %1715 = vmatpush.bf16.msrb.mxu0 %v1640_v4 }
 0x536   : > { %1716 = vmatpush.bf16.msrb.mxu0 %v1639_v9 }
 0x53a   : > { %1717 = vmatpush.bf16.msrb.mxu0 %v1638_v10 }
 0x53d   : > { %1718 = vmatmul.bf16.vlgmr.msrb.gmra.mxu0 %v2100_v11 }
 0x54d   : > { %1723 = vmatmul.bf16.gmra.mxu0 %v2101_v12 }
 0x55d   : > { %1728 = vmatmul.bf16.gmra.mxu0 %v2102_v13 }
 0x56d   : > { %1733 = vmatmul.bf16.gmra.mxu0 %v2103_v14 }
 0x57d   : > { %1738 = vmatmul.bf16.gmra.mxu0 %v2104_v15 }
 0x58d   : > { %1743 = vmatmul.bf16.gmra.mxu0 %v2105_v62 }
 0x59d   : > { %1748 = vmatmul.bf16.gmra.mxu0 %v2106_v2 }
 0x5ad   : > { %1753 = vmatmul.bf16.gmra.mxu0 %v2107_v16 }
 0x5ba   : > { %v1719_v18 = vpop.f32.mrf.mxu0 }
 0x5bb   : > { %v1775_v19 = vadd.f32 %v1759_v17, %v1719_v18 }
 0x5bd   : > { %1791 = vst.msk [vmem:[%s2790_s26] sm:$0xff] %vm453_vm4, %v1775_v19 }
 0x5c2   : > { %v1721_v21 = vpop.f32.mrf.mxu0 }
 0x5c3   : > { %v1776_v59 = vadd.f32 %v1760_v20, %v1721_v21 }
 0x5c5   : > { %1792 = vst.msk [vmem:[%s2790_s26 + $0x8] sm:$0xff] %vm453_vm4, %v1776_v59 }
 0x5ca   : > { %v1724_v23 = vpop.f32.mrf.mxu0 }
 0x5cb   : > { %v1777_v7 = vadd.f32 %v1761_v22, %v1724_v23 }
 0x5cd   : > { %1793 = vst.msk [vmem:[%s2790_s26 + $0x10] sm:$0xff] %vm453_vm4, %v1777_v7 }
 0x5d2   : > { %v1726_v27 = vpop.f32.mrf.mxu0 }
 0x5d3   : > { %v1778_v31 = vadd.f32 %v1762_v24, %v1726_v27 }
 0x5d5   : > { %1794 = vst.msk [vmem:[%s2790_s26 + $0x18] sm:$0xff] %vm453_vm4, %v1778_v31 }
 0x5da   : > { %v1729_v34 = vpop.f32.mrf.mxu0 }
 0x5db   : > { %v1779_v36 = vadd.f32 %v1763_v33, %v1729_v34 }
 0x5dd   : > { %1795 = vst.msk [vmem:[%s2790_s26 + $0x20] sm:$0xff] %vm453_vm4, %v1779_v36 }
 0x5e2   : > { %v1731_v25 = vpop.f32.mrf.mxu0 }
 0x5e3   : > { %v1780_v38 = vadd.f32 %v1764_v37, %v1731_v25 }
 0x5e5   : > { %1796 = vst.msk [vmem:[%s2790_s26 + $0x28] sm:$0xff] %vm453_vm4, %v1780_v38 }
 0x5ea   : > { %v1734_v26 = vpop.f32.mrf.mxu0 }
 0x5eb   : > { %v1781_v29 = vadd.f32 %v1765_v28, %v1734_v26 }
 0x5ed   : > { %1797 = vst.msk [vmem:[%s2790_s26 + $0x30] sm:$0xff] %vm453_vm4, %v1781_v29 }
 0x5f2   : > { %v1736_v35 = vpop.f32.mrf.mxu0 }
 0x5f3   : > { %v1782_v39 = vadd.f32 %v1766_v30, %v1736_v35 }
 0x5f5   : > { %1798 = vst.msk [vmem:[%s2790_s26 + $0x38] sm:$0xff] %vm453_vm4, %v1782_v39 }
 0x5fa   : > { %v1739_v42 = vpop.f32.mrf.mxu0 }
 0x5fb   : > { %v1783_v46 = vadd.f32 %v1767_v40, %v1739_v42 }
 0x5fd   : > { %1799 = vst.msk [vmem:[%s2790_s26 + $0x40] sm:$0xff] %vm453_vm4, %v1783_v46 }
 0x602   : > { %v1741_v50 = vpop.f32.mrf.mxu0 }
 0x603   : > { %v1784_v52 = vadd.f32 %v1768_v49, %v1741_v50 }
 0x605   : > { %1800 = vst.msk [vmem:[%s2790_s26 + $0x48] sm:$0xff] %vm453_vm4, %v1784_v52 }
 0x60a   : > { %v1744_v41 = vpop.f32.mrf.mxu0 }
 0x60b   : > { %v1785_v54 = vadd.f32 %v1769_v53, %v1744_v41 }
 0x60d   : > { %1801 = vst.msk [vmem:[%s2790_s26 + $0x50] sm:$0xff] %vm453_vm4, %v1785_v54 }
 0x612   : > { %v1746_v43 = vpop.f32.mrf.mxu0 }
 0x613   : > { %v1786_v45 = vadd.f32 %v1770_v44, %v1746_v43 }
 0x615   : > { %1802 = vst.msk [vmem:[%s2790_s26 + $0x58] sm:$0xff] %vm453_vm4, %v1786_v45 }
 0x61a   : > { %v1749_v32 = vpop.f32.mrf.mxu0 }
 0x61b   : > { %v1787_v48 = vadd.f32 %v1771_v47, %v1749_v32 }
 0x61d   : > { %1803 = vst.msk [vmem:[%s2790_s26 + $0x60] sm:$0xff] %vm453_vm4, %v1787_v48 }
 0x622   : > { %v1751_v55 = vpop.f32.mrf.mxu0 }
 0x623   : > { %v1788_v56 = vadd.f32 %v1772_v51, %v1751_v55 }
 0x625   : > { %1804 = vst.msk [vmem:[%s2790_s26 + $0x68] sm:$0xff] %vm453_vm4, %v1788_v56 }
 0x62a   : > { %v1754_v58 = vpop.f32.mrf.mxu0 }
 0x62b   : > { %v1789_v60 = vadd.f32 %v1773_v57, %v1754_v58 }
 0x62d   : > { %1805 = vst.msk [vmem:[%s2790_s26 + $0x70] sm:$0xff] %vm453_vm4, %v1789_v60 }
 0x632   : > { %v1756_v63 = vpop.f32.mrf.mxu0 }
 0x633   : > { %v1790_v0 = vadd.f32 %v1774_v61, %v1756_v63 }
 0x635   : > { %1806 = vst.msk [vmem:[%s2790_s26 + $0x78] sm:$0xff] %vm453_vm4, %v1790_v0 }
 0x636 PF: > { %s23_s23 = sadd.s32 1, %s2232_s23   ;;  %s2891_s21 = smov %s2228_s22 }
 0x637   : > { %p20_p8 = scmp.ge.s32.totalorder %s23_s23, 4   ;;  %s2892_s22 = smov %s2894_s25 }
 0x639   :  { %22 = sbr.rel (!%p20_p8) target bundleno = 2 (0x2), region = 111 }
 0x63e   :  { %1828 = vsyncpa [#allocation4], 1 }
 0x63f   :  { %1830 = vsyncpa [#allocation4 + $0x1], 1 }

</bundles_post_ra>
